<compile_context>
chip_gen: v7x
topology: tpu7x:2x2x1
jax: 0.10.0
libtpu: 0.0.40
codegen_flags: <defaults>
</compile_context>

<pallas_src>
import functools

import jax
import jax.numpy as jnp
import numpy as np
from jax.experimental import pallas as pl
from jax.experimental.pallas import tpu as pltpu


# -----------------------------------------------------------------------------
# Small helpers
# -----------------------------------------------------------------------------
def _round_up(x, m):
    return ((x + m - 1) // m) * m


def _selection_matrix(C, W, scale):
    """S[c, w*C + c] = scale.  Folds the 'sum over the W column groups' reduction
    (and, for triplane, the 1/n_planes mean) into a single MXU matmul."""
    r = np.arange(W * C)
    sel = np.zeros((C, W * C), np.float32)
    sel[r % C, r] = scale
    return jnp.asarray(sel)


def _expand_matrix(C, W):
    """E[w*C + c, w] = 1.  Expands a compact [W, TM] x-corner weight to the
    [W*C, TM] row layout on the MXU (vector-extended slot has slack here)."""
    r = np.arange(W * C)
    e = np.zeros((W * C, W), np.float32)
    e[r, r // C] = 1.0
    return jnp.asarray(e)


def _vmem_budget_bytes():
    try:
        info = pltpu.get_tpu_info()
        cap = int(getattr(info, "vmem_capacity_bytes", 64 << 20))
    except Exception:  # pragma: no cover - conservative fallback
        cap = 64 << 20
    return max(32 << 20, int(cap * 0.85))


def _vmem_limit(*byte_counts):
    # Double-buffered blocks + headroom for in-kernel temporaries, capped at
    # ~85% of the physical per-core VMEM (v7x: 64 MiB) so Mosaic keeps scratch.
    est = 2 * sum(int(b) for b in byte_counts) + (6 << 20)
    return int(min(_vmem_budget_bytes(), max(32 << 20, est)))


def _plane_projection_mats(plane_axes):
    """Per-plane 2x3 projection matrices M_p = axes_p[:2] @ (I - n n^T)."""
    axes = jnp.asarray(plane_axes, jnp.float32)
    normals = axes[:, 2]
    normals = normals / jnp.maximum(
        jnp.linalg.norm(normals, axis=-1, keepdims=True), 1e-12)
    proj = (jnp.eye(3, dtype=jnp.float32)[None]
            - normals[:, :, None] * normals[:, None, :])              # [P, 3, 3]
    return jnp.einsum('pak,pkj->paj', axes[:, :2], proj).reshape(-1, 3)  # [2P, 3]


def _prep_points(points, tm, M):
    """[N, M, 3] -> padded [N, 3, Mp] plus the (clamped) point tile size."""
    tm = max(128, min(_round_up(tm, 128), _round_up(M, 128)))
    Mp = _round_up(M, tm)
    pts_t = jnp.transpose(points.astype(jnp.float32), (0, 2, 1))      # [N, 3, M]
    if Mp != M:
        pts_t = jnp.pad(pts_t, ((0, 0), (0, 0), (0, Mp - M)))
    return pts_t, tm, Mp


# -----------------------------------------------------------------------------
# Hoistable feature relayouts (cache these outside the render loop when the
# reference representation is static -- the transposes are full HBM shuffles).
# -----------------------------------------------------------------------------
def prepare_triplane_features(plane_features, feature_dtype=jnp.bfloat16):
    """[N, P, C, H, W] -> channels-last, w-major [N, P, W*C, H] + metadata."""
    N, P, C, H, W = plane_features.shape
    feats = jnp.transpose(plane_features, (0, 1, 4, 2, 3)).reshape(N, P, W * C, H)
    return {"kind": "triplane", "feats": feats.astype(feature_dtype),
            "C": C, "H": H, "W": W, "P": P}


def prepare_volume_features(volume, feature_dtype=jnp.bfloat16):
    """[N, C, D, H, W] -> channels-last, w-major [N, W*C, D*H] + metadata."""
    N, C, D, H, W = volume.shape
    vol = jnp.transpose(volume, (0, 4, 1, 2, 3)).reshape(N, W * C, D * H)
    return {"kind": "volume", "vol": vol.astype(feature_dtype),
            "C": C, "D": D, "H": H, "W": W}


# -----------------------------------------------------------------------------
# In-kernel compute helpers (shared by the standalone and fused hybrid kernels)
# -----------------------------------------------------------------------------
def _triplane_features(pts, mats_ref, feat_ref, sel, exp, *, H, W, C, P):
    """Triplane bilinear sample for one point tile.

    F.grid_sample semantics: bilinear, align_corners=False, padding_mode='zeros'
    (zeros padding falls out of the one-hot construction: out-of-range corner
    indices never match an iota row/column, so their weight is dropped).

    pts: [3, TM] f32.  Returns [C, TM] f32 (mean over planes folded into sel).
    """
    f32 = jnp.float32
    x, y, z = pts[0:1, :], pts[1:2, :], pts[2:3, :]
    TM = pts.shape[1]

    # hoisted iotas, shared across the (unrolled) plane loop
    h_iota = jax.lax.broadcasted_iota(jnp.int32, (H, TM), 0)          # [H, TM]
    w_iota = jax.lax.broadcasted_iota(jnp.int32, (W, TM), 0)          # [W, TM]

    acc = jnp.zeros((C, TM), f32)
    for p in range(P):
        # plane projection: [gx; gy] = M_p @ pts (M_p precomputed, read from SMEM)
        gx = (mats_ref[2 * p, 0] * x + mats_ref[2 * p, 1] * y
              + mats_ref[2 * p, 2] * z)                               # [1, TM]
        gy = (mats_ref[2 * p + 1, 0] * x + mats_ref[2 * p + 1, 1] * y
              + mats_ref[2 * p + 1, 2] * z)                           # [1, TM]

        ix = ((gx + 1.0) * W - 1.0) * 0.5
        iy = ((gy + 1.0) * H - 1.0) * 0.5
        ix0 = jnp.floor(ix)
        iy0 = jnp.floor(iy)
        fx = ix - ix0
        fy = iy - iy0
        ix0i = ix0.astype(jnp.int32)                                  # [1, TM]
        iy0i = iy0.astype(jnp.int32)

        # separable y weights, transposed one-hot: [H, TM]
        wyT = ((h_iota == iy0i).astype(f32) * (1.0 - fy) +
               (h_iota == iy0i + 1).astype(f32) * fy)

        # y contraction on the MXU: [W*C, H] @ [H, TM] -> [W*C, TM]
        feat = feat_ref[0, p]
        tmpT = jnp.dot(feat, wyT.astype(feat.dtype), preferred_element_type=f32)

        # compact x-corner weights [W, TM] (C x less VPU mask work), expanded to
        # the (w, c) rows on the MXU
        wx = ((w_iota == ix0i).astype(f32) * (1.0 - fx) +
              (w_iota == ix0i + 1).astype(f32) * fx)
        wxe = jnp.dot(exp, wx, preferred_element_type=f32)            # [W*C, TM]

        # group-sum over w (with 1/P folded into sel): [C, W*C] @ [W*C, TM]
        acc = acc + jnp.dot(sel, tmpT * wxe, preferred_element_type=f32)
    return acc


def _volume_zy_onehot(pts, *, D, H, t_dh, row_off):
    """Combined (z, y) one-hot weights for (global) rows [row_off, row_off+t_dh).

    grid_sample_3d semantics: align_corners=True-style unnormalization, border-
    clamped corner indices, unclamped trilinear weights.  Corners that clamp
    onto the same row correctly add their weights.
    """
    f32 = jnp.float32
    gy, gz = pts[1:2, :], pts[2:3, :]
    TM = pts.shape[1]
    iy = (gy + 1.0) * 0.5 * (H - 1)
    iz = (gz + 1.0) * 0.5 * (D - 1)
    iy0 = jnp.floor(iy)
    iz0 = jnp.floor(iz)
    fy = iy - iy0
    fz = iz - iz0
    iy0i = iy0.astype(jnp.int32)
    iz0i = iz0.astype(jnp.int32)
    cy0 = jnp.clip(iy0i, 0, H - 1)
    cy1 = jnp.clip(iy0i + 1, 0, H - 1)
    cz0 = jnp.clip(iz0i, 0, D - 1)
    cz1 = jnp.clip(iz0i + 1, 0, D - 1)

    dh_iota = jax.lax.broadcasted_iota(jnp.int32, (t_dh, TM), 0) + row_off
    wzyT = ((dh_iota == cz0 * H + cy0).astype(f32) * ((1.0 - fz) * (1.0 - fy)) +
            (dh_iota == cz0 * H + cy1).astype(f32) * ((1.0 - fz) * fy) +
            (dh_iota == cz1 * H + cy0).astype(f32) * (fz * (1.0 - fy)) +
            (dh_iota == cz1 * H + cy1).astype(f32) * (fz * fy))
    return wzyT                                                       # [t_dh, TM]


def _volume_x_weight(pts, exp, *, W, C):
    """Compact x-corner weight [W, TM], expanded to [W*C, TM] on the MXU."""
    f32 = jnp.float32
    gx = pts[0:1, :]
    TM = pts.shape[1]
    ix = (gx + 1.0) * 0.5 * (W - 1)
    ix0 = jnp.floor(ix)
    fx = ix - ix0
    ix0i = ix0.astype(jnp.int32)
    cx0 = jnp.clip(ix0i, 0, W - 1)
    cx1 = jnp.clip(ix0i + 1, 0, W - 1)
    w_iota = jax.lax.broadcasted_iota(jnp.int32, (W, TM), 0)
    # clamped coincident corners correctly sum their weights
    wx = ((w_iota == cx0).astype(f32) * (1.0 - fx) +
          (w_iota == cx1).astype(f32) * fx)
    return jnp.dot(exp, wx, preferred_element_type=f32)               # [W*C, TM]


def _volume_features_full(pts, vol_ref, sel, exp, *, D, H, W, C):
    """Trilinear sample with the whole [W*C, D*H] slab resident (hybrid path)."""
    f32 = jnp.float32
    vol = vol_ref[0]                                                  # [W*C, D*H]
    wzyT = _volume_zy_onehot(pts, D=D, H=H, t_dh=D * H, row_off=0)
    tmpT = jnp.dot(vol, wzyT.astype(vol.dtype), preferred_element_type=f32)
    wxe = _volume_x_weight(pts, exp, W=W, C=C)
    return jnp.dot(sel, tmpT * wxe, preferred_element_type=f32)       # [C, TM]


# -----------------------------------------------------------------------------
# Kernels
# -----------------------------------------------------------------------------
def _triplane_kernel(mats_ref, sel_ref, exp_ref, pts_ref, feat_ref, out_ref,
                     *, H, W, C, P):
    pts = pts_ref[0].astype(jnp.float32)                              # [3, TM]
    feats = _triplane_features(pts, mats_ref, feat_ref, sel_ref[...],
                               exp_ref[...], H=H, W=W, C=C, P=P)
    out_ref[...] = feats[None]                                        # [1, C, TM]


def _volume_kernel(sel_ref, exp_ref, pts_ref, vol_ref, out_ref, acc_ref,
                   *, D, H, W, C, t_dh):
    """Volume sampling with the D*H reduction axis tiled into grid axis 2.

    Per reduction step only the (z, y) contraction is accumulated (f32 scratch,
    exact: each corner row lands in exactly one D*H tile); the x weighting and
    the group-sum run once on the last step.
    """
    f32 = jnp.float32
    k = pl.program_id(2)
    nk = pl.num_programs(2)

    @pl.when(k == 0)
    def _():
        acc_ref[...] = jnp.zeros_like(acc_ref)

    pts = pts_ref[0].astype(f32)                                      # [3, TM]
    wzyT = _volume_zy_onehot(pts, D=D, H=H, t_dh=t_dh, row_off=k * t_dh)
    vol = vol_ref[0]                                                  # [W*C, t_dh]
    acc_ref[...] += jnp.dot(vol, wzyT.astype(vol.dtype),
                            preferred_element_type=f32)               # [W*C, TM]

    @pl.when(k == nk - 1)
    def _():
        wxe = _volume_x_weight(pts, exp_ref[...], W=W, C=C)
        out_ref[...] = jnp.dot(sel_ref[...], acc_ref[...] * wxe,
                               preferred_element_type=f32)[None]      # [1, C, TM]


def _hybrid_kernel(mats_ref, sel_t_ref, exp_t_ref, sel_v_ref, exp_v_ref,
                   pts_ref, feat_ref, vol_ref, out_ref,
                   *, H_t, W_t, C_t, P, D_v, H_v, W_v, C_v):
    """Fused hybrid path: shares the points block and per-point index math,
    writes one concatenated [1, C_vol + C_tri, TM] lane-dense block."""
    pts = pts_ref[0].astype(jnp.float32)                              # [3, TM]
    vol_feats = _volume_features_full(pts, vol_ref, sel_v_ref[...], exp_v_ref[...],
                                      D=D_v, H=H_v, W=W_v, C=C_v)
    tri_feats = _triplane_features(pts, mats_ref, feat_ref, sel_t_ref[...],
                                   exp_t_ref[...], H=H_t, W=W_t, C=C_t, P=P)
    out_ref[...] = jnp.concatenate([vol_feats, tri_feats], axis=0)[None]


# -----------------------------------------------------------------------------
# Wrappers
# -----------------------------------------------------------------------------
def triplane_sample(points, plane_axes, plane_features=None, *, prepared=None,
                    tm=512, feature_dtype=jnp.bfloat16):
    """points [N, M, 3], plane_axes [P, 3, 3], plane_features [N, P, C, H, W]
    -> [N, M, C] (mean over planes).  Pass `prepared` (prepare_triplane_features)
    to skip the per-call feature relayout."""
    N, M, _ = points.shape
    if prepared is None:
        prepared = prepare_triplane_features(plane_features, feature_dtype)
    feats = prepared["feats"]
    C, H, W, P = prepared["C"], prepared["H"], prepared["W"], prepared["P"]

    mats = _plane_projection_mats(plane_axes)                         # [2P, 3]
    sel = _selection_matrix(C, W, 1.0 / float(P))
    exp = _expand_matrix(C, W)

    pts_t, tm, Mp = _prep_points(points, tm, M)
    dsize = feats.dtype.itemsize
    vmem_limit = _vmem_limit(
        3 * tm * 4,                     # points block
        C * tm * 4,                     # output block
        P * W * C * H * dsize,          # feature block (revisited across m)
        (C + W) * W * C * 4,            # sel + expand constants
        3 * W * C * tm * 4,             # live [W*C, TM] temporaries
        (H + W) * tm * 4)               # one-hot weights

    kernel = functools.partial(_triplane_kernel, H=H, W=W, C=C, P=P)
    # NOTE: n outer / m inner on purpose -- the feature block index depends only
    # on n, so it is revisited (not re-DMA'd) across the inner m tiles.
    out = pl.pallas_call(
        kernel,
        out_shape=jax.ShapeDtypeStruct((N, C, Mp), jnp.float32),
        grid=(N, Mp // tm),
        in_specs=[
            pl.BlockSpec(memory_space=pltpu.MemorySpace.SMEM),          # mats
            pl.BlockSpec((C, W * C), lambda n, m: (0, 0)),              # sel
            pl.BlockSpec((W * C, W), lambda n, m: (0, 0)),              # expand
            pl.BlockSpec((1, 3, tm), lambda n, m: (n, 0, m)),           # points
            pl.BlockSpec((1, P, W * C, H), lambda n, m: (n, 0, 0, 0)),  # features
        ],
        out_specs=pl.BlockSpec((1, C, tm), lambda n, m: (n, 0, m)),
        compiler_params=pltpu.CompilerParams(
            dimension_semantics=("parallel", "parallel"),
            vmem_limit_bytes=vmem_limit),
    )(mats, sel, exp, pts_t, feats)

    # TODO(synk): triplane H-axis reduction tiling (analogous to the volume
    #             D*H tiling) for very large plane resolutions on v7x.
    return jnp.transpose(out[:, :, :M], (0, 2, 1))                     # [N, M, C]


def _choose_dh_tile(DH, WC, dsize, budget_bytes):
    """Largest multiple-of-128 divisor of D*H whose [W*C, t] slab fits budget."""
    if WC * DH * dsize <= budget_bytes:
        return DH
    divs = [t for t in range(128, DH, 128) if DH % t == 0]
    fitting = [t for t in divs if WC * t * dsize <= budget_bytes]
    if fitting:
        return max(fitting)
    return min(divs) if divs else DH


def volume_sample(points, volume=None, *, prepared=None, tm=512,
                  feature_dtype=jnp.bfloat16, dh_tile=None):
    """points [N, M, 3], volume [N, C, D, H, W] -> [N, M, C]."""
    N, M, _ = points.shape
    if prepared is None:
        prepared = prepare_volume_features(volume, feature_dtype)
    vol = prepared["vol"]
    C, D, H, W = prepared["C"], prepared["D"], prepared["H"], prepared["W"]
    DH = D * H
    dsize = vol.dtype.itemsize

    if dh_tile is None:
        # bound the resident volume block so it fits v7x's 64 MiB VMEM
        dh_tile = _choose_dh_tile(DH, W * C, dsize, 12 << 20)
    assert DH % dh_tile == 0 and (dh_tile == DH or dh_tile % 128 == 0), \
        (DH, dh_tile)

    sel = _selection_matrix(C, W, 1.0)
    exp = _expand_matrix(C, W)

    pts_t, tm, Mp = _prep_points(points, tm, M)
    vmem_limit = _vmem_limit(
        3 * tm * 4,
        C * tm * 4,
        W * C * dh_tile * dsize,        # volume block
        (C + W) * W * C * 4,            # sel + expand constants
        W * C * tm * 4,                 # f32 accumulator scratch
        2 * W * C * tm * 4,             # live temporaries
        (dh_tile + W) * tm * 4)

    kernel = functools.partial(_volume_kernel, D=D, H=H, W=W, C=C, t_dh=dh_tile)
    out = pl.pallas_call(
        kernel,
        out_shape=jax.ShapeDtypeStruct((N, C, Mp), jnp.float32),
        grid=(N, Mp // tm, DH // dh_tile),
        in_specs=[
            pl.BlockSpec((C, W * C), lambda n, m, k: (0, 0)),              # sel
            pl.BlockSpec((W * C, W), lambda n, m, k: (0, 0)),              # expand
            pl.BlockSpec((1, 3, tm), lambda n, m, k: (n, 0, m)),           # points
            pl.BlockSpec((1, W * C, dh_tile), lambda n, m, k: (n, 0, k)),  # volume
        ],
        out_specs=pl.BlockSpec((1, C, tm), lambda n, m, k: (n, 0, m)),
        scratch_shapes=[pltpu.VMEM((W * C, tm), jnp.float32)],
        compiler_params=pltpu.CompilerParams(
            dimension_semantics=("parallel", "parallel", "arbitrary"),
            vmem_limit_bytes=vmem_limit),
    )(sel, exp, pts_t, vol)

    return jnp.transpose(out[:, :, :M], (0, 2, 1))                     # [N, M, C]


def hybrid_sample(points, plane_axes, triplane=None, volume=None, *,
                  prepared_triplane=None, prepared_volume=None,
                  tm=512, feature_dtype=jnp.bfloat16):
    """Fused hybrid path -> [N, M, C_vol + C_tri] (volume channels first)."""
    N, M, _ = points.shape
    if prepared_triplane is None:
        prepared_triplane = prepare_triplane_features(triplane, feature_dtype)
    if prepared_volume is None:
        prepared_volume = prepare_volume_features(volume, feature_dtype)

    feats = prepared_triplane["feats"]
    C_t, H_t, W_t, P = (prepared_triplane["C"], prepared_triplane["H"],
                        prepared_triplane["W"], prepared_triplane["P"])
    vol = prepared_volume["vol"]
    C_v, D_v, H_v, W_v = (prepared_volume["C"], prepared_volume["D"],
                          prepared_volume["H"], prepared_volume["W"])
    DH_v = D_v * H_v

    # The fused kernel keeps the whole volume slab resident per n; fall back to
    # two pallas_calls (with D*H reduction tiling) when that would not fit.
    if W_v * C_v * DH_v * vol.dtype.itemsize > (12 << 20):
        feats_tri = triplane_sample(points, plane_axes,
                                    prepared=prepared_triplane, tm=tm)
        feats_vol = volume_sample(points, prepared=prepared_volume, tm=tm)
        return jnp.concatenate([feats_vol, feats_tri], axis=-1)

    mats = _plane_projection_mats(plane_axes)
    sel_t = _selection_matrix(C_t, W_t, 1.0 / float(P))
    exp_t = _expand_matrix(C_t, W_t)
    sel_v = _selection_matrix(C_v, W_v, 1.0)
    exp_v = _expand_matrix(C_v, W_v)

    pts_t, tm, Mp = _prep_points(points, tm, M)
    Cout = C_v + C_t
    vmem_limit = _vmem_limit(
        3 * tm * 4,
        Cout * tm * 4,
        P * W_t * C_t * H_t * feats.dtype.itemsize,
        W_v * C_v * DH_v * vol.dtype.itemsize,
        (C_t + W_t) * W_t * C_t * 4 + (C_v + W_v) * W_v * C_v * 4,
        3 * max(W_t * C_t, W_v * C_v) * tm * 4,
        (H_t + W_t + DH_v + W_v) * tm * 4)

    kernel = functools.partial(_hybrid_kernel, H_t=H_t, W_t=W_t, C_t=C_t, P=P,
                               D_v=D_v, H_v=H_v, W_v=W_v, C_v=C_v)
    out = pl.pallas_call(
        kernel,
        out_shape=jax.ShapeDtypeStruct((N, Cout, Mp), jnp.float32),
        grid=(N, Mp // tm),
        in_specs=[
            pl.BlockSpec(memory_space=pltpu.MemorySpace.SMEM),               # mats
            pl.BlockSpec((C_t, W_t * C_t), lambda n, m: (0, 0)),             # sel tri
            pl.BlockSpec((W_t * C_t, W_t), lambda n, m: (0, 0)),             # exp tri
            pl.BlockSpec((C_v, W_v * C_v), lambda n, m: (0, 0)),             # sel vol
            pl.BlockSpec((W_v * C_v, W_v), lambda n, m: (0, 0)),             # exp vol
            pl.BlockSpec((1, 3, tm), lambda n, m: (n, 0, m)),                # points
            pl.BlockSpec((1, P, W_t * C_t, H_t), lambda n, m: (n, 0, 0, 0)), # tri
            pl.BlockSpec((1, W_v * C_v, DH_v), lambda n, m: (n, 0, 0)),      # vol
        ],
        out_specs=pl.BlockSpec((1, Cout, tm), lambda n, m: (n, 0, m)),
        compiler_params=pltpu.CompilerParams(
            dimension_semantics=("parallel", "parallel"),
            vmem_limit_bytes=vmem_limit),
    )(mats, sel_t, exp_t, sel_v, exp_v, pts_t, feats, vol)

    return jnp.transpose(out[:, :, :M], (0, 2, 1))                     # [N, M, Cout]


# -----------------------------------------------------------------------------
# PointRepresenter (JAX/Pallas)
# -----------------------------------------------------------------------------
_REPRESENTATION_TYPES = ['coordinate', 'volume', 'triplane', 'hybrid', 'mpi']

_DEFAULT_TRIPLANE_AXES = jnp.array(
    [[[1, 0, 0], [0, 1, 0], [0, 0, 1]],
     [[1, 0, 0], [0, 0, 1], [0, 1, 0]],
     [[0, 0, 1], [0, 1, 0], [1, 0, 0]]], dtype=jnp.float32)


class PointRepresenter:
    def __init__(self, representation_type='coordinate', triplane_axes=None,
                 mpi_levels=None, coordinate_scale=None, bound=None,
                 return_eikonal=False, feature_dtype=jnp.bfloat16,
                 point_tile=512):
        self.coordinate_scale = None
        if coordinate_scale is not None and coordinate_scale > 0:
            self.coordinate_scale = float(coordinate_scale)
        self.bound = None if bound is None else jnp.asarray(bound, jnp.float32)
        self.return_eikonal = return_eikonal
        self.feature_dtype = feature_dtype
        self.point_tile = point_tile
        representation_type = representation_type.lower()
        if representation_type not in _REPRESENTATION_TYPES:
            raise ValueError(f'Invalid representation type: {representation_type}')
        self.representation_type = representation_type
        if self.representation_type in ['triplane', 'hybrid']:
            self.triplane_axes = (_DEFAULT_TRIPLANE_AXES if triplane_axes is None
                                  else jnp.asarray(triplane_axes, jnp.float32))
        self.mpi_levels = mpi_levels

    def prepare_reference(self, ref_representation):
        """Hoist the (HBM-shuffle) feature relayouts out of the per-call path."""
        if self.representation_type == 'volume':
            return prepare_volume_features(ref_representation, self.feature_dtype)
        if self.representation_type == 'triplane':
            return prepare_triplane_features(ref_representation, self.feature_dtype)
        if self.representation_type == 'hybrid':
            tri, vol = ref_representation[0], ref_representation[1]
            return (prepare_triplane_features(tri, self.feature_dtype),
                    prepare_volume_features(vol, self.feature_dtype))
        return ref_representation

    def __call__(self, points, ref_representation=None, align_corners=False):
        if self.representation_type == 'coordinate':
            return points
        if self.representation_type == 'mpi':
            # TODO(synk): MPI retrieval (per-level argmax + gather) not implemented.
            raise NotImplementedError('mpi representation not implemented')
        assert not align_corners, \
            'TODO(synk): align_corners=True triplane path not implemented'
        assert not self.return_eikonal, \
            'TODO(synk): return_eikonal grid_sample variant not implemented'

        if self.coordinate_scale is not None:
            normalized_points = (2.0 / self.coordinate_scale) * points
        elif self.bound is not None:
            lo = self.bound[:, :1]
            hi = self.bound[:, 1:]
            normalized_points = 2.0 * (points - lo) / (hi - lo) - 1.0
        else:
            normalized_points = points

        kw = dict(tm=self.point_tile, feature_dtype=self.feature_dtype)
        if self.representation_type == 'volume':
            if isinstance(ref_representation, dict):
                return volume_sample(normalized_points,
                                     prepared=ref_representation, **kw)
            return volume_sample(normalized_points, ref_representation, **kw)
        if self.representation_type == 'triplane':
            if isinstance(ref_representation, dict):
                return triplane_sample(normalized_points, self.triplane_axes,
                                       prepared=ref_representation, **kw)
            return triplane_sample(normalized_points, self.triplane_axes,
                                   ref_representation, **kw)
        if self.representation_type == 'hybrid':
            tri, vol = ref_representation[0], ref_representation[1]
            prep_t = tri if isinstance(tri, dict) else None
            prep_v = vol if isinstance(vol, dict) else None
            return hybrid_sample(normalized_points, self.triplane_axes,
                                 None if prep_t is not None else tri,
                                 None if prep_v is not None else vol,
                                 prepared_triplane=prep_t,
                                 prepared_volume=prep_v, **kw)
        raise NotImplementedError(self.representation_type)


# -----------------------------------------------------------------------------
# Pure-JAX references (mirror the PyTorch semantics) for validation
# -----------------------------------------------------------------------------
def _ref_triplane(points, planes, feats):
    N, M, _ = points.shape
    P = planes.shape[0]
    C, H, W = feats.shape[2], feats.shape[3], feats.shape[4]
    normals = planes[:, 2]
    normals = normals / jnp.maximum(
        jnp.linalg.norm(normals, axis=1, keepdims=True), 1e-12)
    pts = jnp.broadcast_to(points[:, None], (N, P, M, 3))
    d = jnp.sum(pts * normals[None, :, None, :], axis=-1, keepdims=True)
    proj3 = pts - d * normals[None, :, None, :]
    proj = jnp.einsum('npmk,pak->npma', proj3, planes)[..., :2]
    gx, gy = proj[..., 0], proj[..., 1]
    ix = ((gx + 1.0) * W - 1.0) * 0.5
    iy = ((gy + 1.0) * H - 1.0) * 0.5
    ix0 = jnp.floor(ix)
    iy0 = jnp.floor(iy)
    fx = ix - ix0
    fy = iy - iy0
    feats_t = jnp.transpose(feats, (0, 1, 3, 4, 2))   # [N, P, H, W, C]
    nidx = jnp.arange(N)[:, None, None]
    pidx = jnp.arange(P)[None, :, None]

    def corner(cx, cy, w):
        inb = (cx >= 0) & (cx <= W - 1) & (cy >= 0) & (cy <= H - 1)
        w = jnp.where(inb, w, 0.0)
        cxc = jnp.clip(cx, 0, W - 1).astype(jnp.int32)
        cyc = jnp.clip(cy, 0, H - 1).astype(jnp.int32)
        val = feats_t[nidx, pidx, cyc, cxc]
        return val * w[..., None]

    out = (corner(ix0, iy0, (1 - fx) * (1 - fy)) +
           corner(ix0 + 1, iy0, fx * (1 - fy)) +
           corner(ix0, iy0 + 1, (1 - fx) * fy) +
           corner(ix0 + 1, iy0 + 1, fx * fy))
    return out.mean(axis=1)


def _ref_volume(points, volume):
    N, M, _ = points.shape
    C, D, H, W = volume.shape[1:]
    gx, gy, gz = points[..., 0], points[..., 1], points[..., 2]
    ix = (gx + 1.0) * 0.5 * (W - 1)
    iy = (gy + 1.0) * 0.5 * (H - 1)
    iz = (gz + 1.0) * 0.5 * (D - 1)
    ix0 = jnp.floor(ix)
    iy0 = jnp.floor(iy)
    iz0 = jnp.floor(iz)
    fx = ix - ix0
    fy = iy - iy0
    fz = iz - iz0
    vol_t = jnp.transpose(volume, (0, 2, 3, 4, 1))   # [N, D, H, W, C]
    nidx = jnp.arange(N)[:, None]

    def corner(cx, cy, cz, w):
        cxc = jnp.clip(cx, 0, W - 1).astype(jnp.int32)
        cyc = jnp.clip(cy, 0, H - 1).astype(jnp.int32)
        czc = jnp.clip(cz, 0, D - 1).astype(jnp.int32)
        val = vol_t[nidx, czc, cyc, cxc]
        return val * w[..., None]

    out = (corner(ix0, iy0, iz0, (1 - fx) * (1 - fy) * (1 - fz)) +
           corner(ix0 + 1, iy0, iz0, fx * (1 - fy) * (1 - fz)) +
           corner(ix0, iy0 + 1, iz0, (1 - fx) * fy * (1 - fz)) +
           corner(ix0 + 1, iy0 + 1, iz0, fx * fy * (1 - fz)) +
           corner(ix0, iy0, iz0 + 1, (1 - fx) * (1 - fy) * fz) +
           corner(ix0 + 1, iy0, iz0 + 1, fx * (1 - fy) * fz) +
           corner(ix0, iy0 + 1, iz0 + 1, (1 - fx) * fy * fz) +
           corner(ix0 + 1, iy0 + 1, iz0 + 1, fx * fy * fz))
    return out


if __name__ == "__main__":
    key = jax.random.PRNGKey(0)
    k1, k2, k3, k4, k5 = jax.random.split(key, 5)

    # ---- hybrid (fused kernel) --------------------------------------------
    N, M = 2, 128
    C_tri, Ht, Wt = 8, 16, 16
    C_vol, Dv, Hv, Wv = 8, 8, 8, 8

    # points slightly outside [-1, 1] to exercise zeros-padding / border clamp
    points = jax.random.uniform(k1, (N, M, 3), jnp.float32, -1.1, 1.1)
    tri_feats = jax.random.normal(k2, (N, 3, C_tri, Ht, Wt), jnp.float32)
    vol_feats = jax.random.normal(k3, (N, C_vol, Dv, Hv, Wv), jnp.float32)

    norm_pts = (2.0 / 2.0) * points    # coordinate_scale=2.0 -> identity
    ref_tri = _ref_triplane(norm_pts, _DEFAULT_TRIPLANE_AXES, tri_feats)
    ref_vol = _ref_volume(norm_pts, vol_feats)
    ref_hyb = jnp.concatenate([ref_vol, ref_tri], axis=-1)

    # f32-feature path: tight validation of the sampling algorithm
    rep_f32 = PointRepresenter('hybrid', coordinate_scale=2.0,
                               feature_dtype=jnp.float32)
    out_f32 = jax.block_until_ready(rep_f32(points, (tri_feats, vol_feats)))
    assert out_f32.shape == (N, M, C_vol + C_tri), out_f32.shape
    np.testing.assert_allclose(np.asarray(out_f32), np.asarray(ref_hyb),
                               rtol=1e-4, atol=1e-4)

    # default bf16-feature path (halves HBM/VMEM traffic): loose tolerance
    rep_bf16 = PointRepresenter('hybrid', coordinate_scale=2.0)
    out_bf16 = jax.block_until_ready(rep_bf16(points, (tri_feats, vol_feats)))
    np.testing.assert_allclose(np.asarray(out_bf16), np.asarray(ref_hyb),
                               rtol=5e-2, atol=8e-2)

    # ---- triplane only: non-multiple-of-128 point count + prepared path ----
    M2 = 200
    pts2 = jax.random.uniform(k4, (1, M2, 3), jnp.float32, -1.1, 1.1)
    tri2 = jax.random.normal(k2, (1, 3, C_tri, Ht, Wt), jnp.float32)
    rep_t = PointRepresenter('triplane', coordinate_scale=2.0,
                             feature_dtype=jnp.float32)
    out_t = jax.block_until_ready(rep_t(pts2, tri2))
    ref_t2 = _ref_triplane(pts2, _DEFAULT_TRIPLANE_AXES, tri2)
    np.testing.assert_allclose(np.asarray(out_t), np.asarray(ref_t2),
                               rtol=1e-4, atol=1e-4)
    prep = rep_t.prepare_reference(tri2)          # hoisted feature relayout
    out_tp = jax.block_until_ready(rep_t(pts2, prep))
    np.testing.assert_allclose(np.asarray(out_tp), np.asarray(out_t),
                               rtol=1e-6, atol=1e-6)

    # ---- volume only: exercise the D*H-tiled reduction path (2 steps) ------
    Dv2, Hv2, Wv2, Cv2 = 16, 16, 8, 8             # D*H = 256 -> two 128-row tiles
    pts3 = jax.random.uniform(k5, (1, 160, 3), jnp.float32, -1.1, 1.1)
    vol3 = jax.random.normal(k3, (1, Cv2, Dv2, Hv2, Wv2), jnp.float32)
    out_v = jax.block_until_ready(
        volume_sample(pts3, vol3, feature_dtype=jnp.float32, dh_tile=128))
    ref_v3 = _ref_volume(pts3, vol3)
    np.testing.assert_allclose(np.asarray(out_v), np.asarray(ref_v3),
                               rtol=1e-4, atol=1e-4)

    # ---- plain 'coordinate' path -------------------------------------------
    rep_c = PointRepresenter('coordinate')
    _ = jax.block_until_ready(rep_c(points))

    print("KERNEL_OK")
</pallas_src>

<mosaic_0001>
module attributes {stable_mosaic.version = 11 : i64} {
  func.func @_hybrid_kernel(%arg0: i32, %arg1: i32, %arg2: memref<6x3xf32, #tpu.memory_space<smem>>, %arg3: memref<8x128xf32, #tpu.memory_space<vmem>>, %arg4: memref<128x16xf32, #tpu.memory_space<vmem>>, %arg5: memref<8x64xf32, #tpu.memory_space<vmem>>, %arg6: memref<64x8xf32, #tpu.memory_space<vmem>>, %arg7: memref<1x3x128xf32, #tpu.memory_space<vmem>>, %arg8: memref<1x3x128x16xf32, #tpu.memory_space<vmem>>, %arg9: memref<1x64x64xf32, #tpu.memory_space<vmem>>, %arg10: memref<1x16x128xf32, #tpu.memory_space<vmem>>) attributes {dimension_semantics = [#tpu.dimension_semantics<parallel>, #tpu.dimension_semantics<parallel>], iteration_bounds = array<i64: 2, 1>, scalar_prefetch = 0 : i64, scratch_operands = 0 : i64, tpu.core_type = #tpu.core_type<tc>, window_params = [{transform_indices = @transform_0, window_bounds = array<i64: 6, 3>}, {pipeline_mode = #tpu.pipeline_mode<synchronous>, transform_indices = @transform_1, window_bounds = array<i64: 8, 128>}, {pipeline_mode = #tpu.pipeline_mode<synchronous>, transform_indices = @transform_2, window_bounds = array<i64: 128, 16>}, {pipeline_mode = #tpu.pipeline_mode<synchronous>, transform_indices = @transform_3, window_bounds = array<i64: 8, 64>}, {pipeline_mode = #tpu.pipeline_mode<synchronous>, transform_indices = @transform_4, window_bounds = array<i64: 64, 8>}, {transform_indices = @transform_5, window_bounds = array<i64: 1, 3, 128>}, {transform_indices = @transform_6, window_bounds = array<i64: 1, 3, 128, 16>}, {transform_indices = @transform_7, window_bounds = array<i64: 1, 64, 64>}, {transform_indices = @transform_8, window_bounds = array<i64: 1, 16, 128>}]} {
    %c0 = arith.constant 0 : index
    %c0_0 = arith.constant 0 : index
    %c0_1 = arith.constant 0 : index
    %0 = vector.load %arg7[%c0, %c0_0, %c0_1] : memref<1x3x128xf32, #tpu.memory_space<vmem>>, vector<1x3x128xf32>
    %1 = vector.shape_cast %0 : vector<1x3x128xf32> to vector<3x128xf32>
    %c0_2 = arith.constant 0 : index
    %c0_3 = arith.constant 0 : index
    %2 = vector.load %arg5[%c0_2, %c0_3] : memref<8x64xf32, #tpu.memory_space<vmem>>, vector<8x64xf32>
    %c0_4 = arith.constant 0 : index
    %c0_5 = arith.constant 0 : index
    %3 = vector.load %arg6[%c0_4, %c0_5] : memref<64x8xf32, #tpu.memory_space<vmem>>, vector<64x8xf32>
    %c0_6 = arith.constant 0 : index
    %c0_7 = arith.constant 0 : index
    %c0_8 = arith.constant 0 : index
    %4 = vector.load %arg9[%c0_6, %c0_7, %c0_8] : memref<1x64x64xf32, #tpu.memory_space<vmem>>, vector<1x64x64xf32>
    %5 = vector.shape_cast %4 : vector<1x64x64xf32> to vector<64x64xf32>
    %6 = vector.extract_strided_slice %1 {offsets = [1, 0], sizes = [1, 128], strides = [1, 1]} : vector<3x128xf32> to vector<1x128xf32>
    %7 = vector.extract_strided_slice %1 {offsets = [2, 0], sizes = [1, 128], strides = [1, 1]} : vector<3x128xf32> to vector<1x128xf32>
    %cst = arith.constant 1.000000e+00 : f32
    %8 = vector.broadcast %cst : f32 to vector<1x128xf32>
    %9 = arith.addf %6, %8 : vector<1x128xf32>
    %cst_9 = arith.constant 5.000000e-01 : f32
    %10 = vector.broadcast %cst_9 : f32 to vector<1x128xf32>
    %11 = arith.mulf %9, %10 : vector<1x128xf32>
    %cst_10 = arith.constant 7.000000e+00 : f32
    %12 = vector.broadcast %cst_10 : f32 to vector<1x128xf32>
    %13 = arith.mulf %11, %12 : vector<1x128xf32>
    %cst_11 = arith.constant 1.000000e+00 : f32
    %14 = vector.broadcast %cst_11 : f32 to vector<1x128xf32>
    %15 = arith.addf %7, %14 : vector<1x128xf32>
    %cst_12 = arith.constant 5.000000e-01 : f32
    %16 = vector.broadcast %cst_12 : f32 to vector<1x128xf32>
    %17 = arith.mulf %15, %16 : vector<1x128xf32>
    %cst_13 = arith.constant 7.000000e+00 : f32
    %18 = vector.broadcast %cst_13 : f32 to vector<1x128xf32>
    %19 = arith.mulf %17, %18 : vector<1x128xf32>
    %20 = math.floor %13 : vector<1x128xf32>
    %21 = math.floor %19 : vector<1x128xf32>
    %22 = arith.subf %13, %20 : vector<1x128xf32>
    %23 = arith.subf %19, %21 : vector<1x128xf32>
    %24 = arith.fptosi %20 : vector<1x128xf32> to vector<1x128xi32>
    %25 = arith.fptosi %21 : vector<1x128xf32> to vector<1x128xi32>
    %c0_i32 = arith.constant 0 : i32
    %c7_i32 = arith.constant 7 : i32
    %26 = vector.broadcast %c0_i32 : i32 to vector<1x128xi32>
    %27 = arith.maxsi %26, %24 : vector<1x128xi32>
    %28 = vector.broadcast %c7_i32 : i32 to vector<1x128xi32>
    %29 = arith.minsi %28, %27 : vector<1x128xi32>
    %c1_i32 = arith.constant 1 : i32
    %30 = vector.broadcast %c1_i32 : i32 to vector<1x128xi32>
    %31 = arith.addi %24, %30 : vector<1x128xi32>
    %c0_i32_14 = arith.constant 0 : i32
    %c7_i32_15 = arith.constant 7 : i32
    %32 = vector.broadcast %c0_i32_14 : i32 to vector<1x128xi32>
    %33 = arith.maxsi %32, %31 : vector<1x128xi32>
    %34 = vector.broadcast %c7_i32_15 : i32 to vector<1x128xi32>
    %35 = arith.minsi %34, %33 : vector<1x128xi32>
    %c0_i32_16 = arith.constant 0 : i32
    %c7_i32_17 = arith.constant 7 : i32
    %36 = vector.broadcast %c0_i32_16 : i32 to vector<1x128xi32>
    %37 = arith.maxsi %36, %25 : vector<1x128xi32>
    %38 = vector.broadcast %c7_i32_17 : i32 to vector<1x128xi32>
    %39 = arith.minsi %38, %37 : vector<1x128xi32>
    %c1_i32_18 = arith.constant 1 : i32
    %40 = vector.broadcast %c1_i32_18 : i32 to vector<1x128xi32>
    %41 = arith.addi %25, %40 : vector<1x128xi32>
    %c0_i32_19 = arith.constant 0 : i32
    %c7_i32_20 = arith.constant 7 : i32
    %42 = vector.broadcast %c0_i32_19 : i32 to vector<1x128xi32>
    %43 = arith.maxsi %42, %41 : vector<1x128xi32>
    %44 = vector.broadcast %c7_i32_20 : i32 to vector<1x128xi32>
    %45 = arith.minsi %44, %43 : vector<1x128xi32>
    %46 = tpu.iota {dimensions = array<i32: 0>} : vector<64x128xi32>
    %c0_i32_21 = arith.constant 0 : i32
    %47 = vector.broadcast %c0_i32_21 : i32 to vector<64x128xi32>
    %48 = arith.addi %46, %47 : vector<64x128xi32>
    %c8_i32 = arith.constant 8 : i32
    %49 = vector.broadcast %c8_i32 : i32 to vector<1x128xi32>
    %50 = arith.muli %39, %49 : vector<1x128xi32>
    %51 = arith.addi %50, %29 : vector<1x128xi32>
    %52 = vector.broadcast %51 : vector<1x128xi32> to vector<64x128xi32>
    %53 = arith.cmpi eq, %48, %52 : vector<64x128xi32>
    %54 = arith.extui %53 : vector<64x128xi1> to vector<64x128xi32>
    %55 = arith.sitofp %54 : vector<64x128xi32> to vector<64x128xf32>
    %cst_22 = arith.constant 1.000000e+00 : f32
    %56 = vector.broadcast %cst_22 : f32 to vector<1x128xf32>
    %57 = arith.subf %56, %23 : vector<1x128xf32>
    %cst_23 = arith.constant 1.000000e+00 : f32
    %58 = vector.broadcast %cst_23 : f32 to vector<1x128xf32>
    %59 = arith.subf %58, %22 : vector<1x128xf32>
    %60 = arith.mulf %57, %59 : vector<1x128xf32>
    %61 = vector.broadcast %60 : vector<1x128xf32> to vector<64x128xf32>
    %62 = arith.mulf %55, %61 : vector<64x128xf32>
    %c8_i32_24 = arith.constant 8 : i32
    %63 = vector.broadcast %c8_i32_24 : i32 to vector<1x128xi32>
    %64 = arith.muli %39, %63 : vector<1x128xi32>
    %65 = arith.addi %64, %35 : vector<1x128xi32>
    %66 = vector.broadcast %65 : vector<1x128xi32> to vector<64x128xi32>
    %67 = arith.cmpi eq, %48, %66 : vector<64x128xi32>
    %68 = arith.extui %67 : vector<64x128xi1> to vector<64x128xi32>
    %69 = arith.sitofp %68 : vector<64x128xi32> to vector<64x128xf32>
    %cst_25 = arith.constant 1.000000e+00 : f32
    %70 = vector.broadcast %cst_25 : f32 to vector<1x128xf32>
    %71 = arith.subf %70, %23 : vector<1x128xf32>
    %72 = arith.mulf %71, %22 : vector<1x128xf32>
    %73 = vector.broadcast %72 : vector<1x128xf32> to vector<64x128xf32>
    %74 = arith.mulf %69, %73 : vector<64x128xf32>
    %75 = arith.addf %62, %74 : vector<64x128xf32>
    %c8_i32_26 = arith.constant 8 : i32
    %76 = vector.broadcast %c8_i32_26 : i32 to vector<1x128xi32>
    %77 = arith.muli %45, %76 : vector<1x128xi32>
    %78 = arith.addi %77, %29 : vector<1x128xi32>
    %79 = vector.broadcast %78 : vector<1x128xi32> to vector<64x128xi32>
    %80 = arith.cmpi eq, %48, %79 : vector<64x128xi32>
    %81 = arith.extui %80 : vector<64x128xi1> to vector<64x128xi32>
    %82 = arith.sitofp %81 : vector<64x128xi32> to vector<64x128xf32>
    %cst_27 = arith.constant 1.000000e+00 : f32
    %83 = vector.broadcast %cst_27 : f32 to vector<1x128xf32>
    %84 = arith.subf %83, %22 : vector<1x128xf32>
    %85 = arith.mulf %23, %84 : vector<1x128xf32>
    %86 = vector.broadcast %85 : vector<1x128xf32> to vector<64x128xf32>
    %87 = arith.mulf %82, %86 : vector<64x128xf32>
    %88 = arith.addf %75, %87 : vector<64x128xf32>
    %c8_i32_28 = arith.constant 8 : i32
    %89 = vector.broadcast %c8_i32_28 : i32 to vector<1x128xi32>
    %90 = arith.muli %45, %89 : vector<1x128xi32>
    %91 = arith.addi %90, %35 : vector<1x128xi32>
    %92 = vector.broadcast %91 : vector<1x128xi32> to vector<64x128xi32>
    %93 = arith.cmpi eq, %48, %92 : vector<64x128xi32>
    %94 = arith.extui %93 : vector<64x128xi1> to vector<64x128xi32>
    %95 = arith.sitofp %94 : vector<64x128xi32> to vector<64x128xf32>
    %96 = arith.mulf %23, %22 : vector<1x128xf32>
    %97 = vector.broadcast %96 : vector<1x128xf32> to vector<64x128xf32>
    %98 = arith.mulf %95, %97 : vector<64x128xf32>
    %99 = arith.addf %88, %98 : vector<64x128xf32>
    %cst_29 = arith.constant dense<0.000000e+00> : vector<64x128xf32>
    %100 = tpu.matmul %5, %99, %cst_29 {dimension_numbers = #tpu.dot_dimension_numbers<[1], [0], [0], [1], [0, 0, 1, 1], [], []>} : vector<64x64xf32>, vector<64x128xf32>, vector<64x128xf32> -> vector<64x128xf32>
    %101 = vector.extract_strided_slice %1 {offsets = [0, 0], sizes = [1, 128], strides = [1, 1]} : vector<3x128xf32> to vector<1x128xf32>
    %cst_30 = arith.constant 1.000000e+00 : f32
    %102 = vector.broadcast %cst_30 : f32 to vector<1x128xf32>
    %103 = arith.addf %101, %102 : vector<1x128xf32>
    %cst_31 = arith.constant 5.000000e-01 : f32
    %104 = vector.broadcast %cst_31 : f32 to vector<1x128xf32>
    %105 = arith.mulf %103, %104 : vector<1x128xf32>
    %cst_32 = arith.constant 7.000000e+00 : f32
    %106 = vector.broadcast %cst_32 : f32 to vector<1x128xf32>
    %107 = arith.mulf %105, %106 : vector<1x128xf32>
    %108 = math.floor %107 : vector<1x128xf32>
    %109 = arith.subf %107, %108 : vector<1x128xf32>
    %110 = arith.fptosi %108 : vector<1x128xf32> to vector<1x128xi32>
    %c0_i32_33 = arith.constant 0 : i32
    %c7_i32_34 = arith.constant 7 : i32
    %111 = vector.broadcast %c0_i32_33 : i32 to vector<1x128xi32>
    %112 = arith.maxsi %111, %110 : vector<1x128xi32>
    %113 = vector.broadcast %c7_i32_34 : i32 to vector<1x128xi32>
    %114 = arith.minsi %113, %112 : vector<1x128xi32>
    %c1_i32_35 = arith.constant 1 : i32
    %115 = vector.broadcast %c1_i32_35 : i32 to vector<1x128xi32>
    %116 = arith.addi %110, %115 : vector<1x128xi32>
    %c0_i32_36 = arith.constant 0 : i32
    %c7_i32_37 = arith.constant 7 : i32
    %117 = vector.broadcast %c0_i32_36 : i32 to vector<1x128xi32>
    %118 = arith.maxsi %117, %116 : vector<1x128xi32>
    %119 = vector.broadcast %c7_i32_37 : i32 to vector<1x128xi32>
    %120 = arith.minsi %119, %118 : vector<1x128xi32>
    %121 = tpu.iota {dimensions = array<i32: 0>} : vector<8x128xi32>
    %122 = vector.broadcast %114 : vector<1x128xi32> to vector<8x128xi32>
    %123 = arith.cmpi eq, %121, %122 : vector<8x128xi32>
    %124 = arith.extui %123 : vector<8x128xi1> to vector<8x128xi32>
    %125 = arith.sitofp %124 : vector<8x128xi32> to vector<8x128xf32>
    %cst_38 = arith.constant 1.000000e+00 : f32
    %126 = vector.broadcast %cst_38 : f32 to vector<1x128xf32>
    %127 = arith.subf %126, %109 : vector<1x128xf32>
    %128 = vector.broadcast %127 : vector<1x128xf32> to vector<8x128xf32>
    %129 = arith.mulf %125, %128 : vector<8x128xf32>
    %130 = vector.broadcast %120 : vector<1x128xi32> to vector<8x128xi32>
    %131 = arith.cmpi eq, %121, %130 : vector<8x128xi32>
    %132 = arith.extui %131 : vector<8x128xi1> to vector<8x128xi32>
    %133 = arith.sitofp %132 : vector<8x128xi32> to vector<8x128xf32>
    %134 = vector.broadcast %109 : vector<1x128xf32> to vector<8x128xf32>
    %135 = arith.mulf %133, %134 : vector<8x128xf32>
    %136 = arith.addf %129, %135 : vector<8x128xf32>
    %cst_39 = arith.constant dense<0.000000e+00> : vector<64x128xf32>
    %137 = tpu.matmul %3, %136, %cst_39 {dimension_numbers = #tpu.dot_dimension_numbers<[1], [0], [0], [1], [0, 0, 1, 1], [], []>} : vector<64x8xf32>, vector<8x128xf32>, vector<64x128xf32> -> vector<64x128xf32>
    %138 = arith.mulf %100, %137 : vector<64x128xf32>
    %cst_40 = arith.constant dense<0.000000e+00> : vector<8x128xf32>
    %139 = tpu.matmul %2, %138, %cst_40 {dimension_numbers = #tpu.dot_dimension_numbers<[1], [0], [0], [1], [0, 0, 1, 1], [], []>} : vector<8x64xf32>, vector<64x128xf32>, vector<8x128xf32> -> vector<8x128xf32>
    %c0_41 = arith.constant 0 : index
    %c0_42 = arith.constant 0 : index
    %140 = vector.load %arg3[%c0_41, %c0_42] : memref<8x128xf32, #tpu.memory_space<vmem>>, vector<8x128xf32>
    %c0_43 = arith.constant 0 : index
    %c0_44 = arith.constant 0 : index
    %141 = vector.load %arg4[%c0_43, %c0_44] : memref<128x16xf32, #tpu.memory_space<vmem>>, vector<128x16xf32>
    %142 = vector.extract_strided_slice %1 {offsets = [0, 0], sizes = [1, 128], strides = [1, 1]} : vector<3x128xf32> to vector<1x128xf32>
    %143 = vector.extract_strided_slice %1 {offsets = [1, 0], sizes = [1, 128], strides = [1, 1]} : vector<3x128xf32> to vector<1x128xf32>
    %144 = vector.extract_strided_slice %1 {offsets = [2, 0], sizes = [1, 128], strides = [1, 1]} : vector<3x128xf32> to vector<1x128xf32>
    %145 = tpu.iota {dimensions = array<i32: 0>} : vector<16x128xi32>
    %146 = tpu.iota {dimensions = array<i32: 0>} : vector<16x128xi32>
    %cst_45 = arith.constant 0.000000e+00 : f32
    %147 = vector.broadcast %cst_45 : f32 to vector<8x128xf32>
    %c0_46 = arith.constant 0 : index
    %c0_47 = arith.constant 0 : index
    %148 = memref.load %arg2[%c0_46, %c0_47] : memref<6x3xf32, #tpu.memory_space<smem>>
    %149 = vector.broadcast %148 : f32 to vector<1x128xf32>
    %150 = arith.mulf %149, %142 : vector<1x128xf32>
    %c0_48 = arith.constant 0 : index
    %c1 = arith.constant 1 : index
    %151 = memref.load %arg2[%c0_48, %c1] : memref<6x3xf32, #tpu.memory_space<smem>>
    %152 = vector.broadcast %151 : f32 to vector<1x128xf32>
    %153 = arith.mulf %152, %143 : vector<1x128xf32>
    %154 = arith.addf %150, %153 : vector<1x128xf32>
    %c0_49 = arith.constant 0 : index
    %c2 = arith.constant 2 : index
    %155 = memref.load %arg2[%c0_49, %c2] : memref<6x3xf32, #tpu.memory_space<smem>>
    %156 = vector.broadcast %155 : f32 to vector<1x128xf32>
    %157 = arith.mulf %156, %144 : vector<1x128xf32>
    %158 = arith.addf %154, %157 : vector<1x128xf32>
    %c1_50 = arith.constant 1 : index
    %c0_51 = arith.constant 0 : index
    %159 = memref.load %arg2[%c1_50, %c0_51] : memref<6x3xf32, #tpu.memory_space<smem>>
    %160 = vector.broadcast %159 : f32 to vector<1x128xf32>
    %161 = arith.mulf %160, %142 : vector<1x128xf32>
    %c1_52 = arith.constant 1 : index
    %c1_53 = arith.constant 1 : index
    %162 = memref.load %arg2[%c1_52, %c1_53] : memref<6x3xf32, #tpu.memory_space<smem>>
    %163 = vector.broadcast %162 : f32 to vector<1x128xf32>
    %164 = arith.mulf %163, %143 : vector<1x128xf32>
    %165 = arith.addf %161, %164 : vector<1x128xf32>
    %c1_54 = arith.constant 1 : index
    %c2_55 = arith.constant 2 : index
    %166 = memref.load %arg2[%c1_54, %c2_55] : memref<6x3xf32, #tpu.memory_space<smem>>
    %167 = vector.broadcast %166 : f32 to vector<1x128xf32>
    %168 = arith.mulf %167, %144 : vector<1x128xf32>
    %169 = arith.addf %165, %168 : vector<1x128xf32>
    %cst_56 = arith.constant 1.000000e+00 : f32
    %170 = vector.broadcast %cst_56 : f32 to vector<1x128xf32>
    %171 = arith.addf %158, %170 : vector<1x128xf32>
    %cst_57 = arith.constant 1.600000e+01 : f32
    %172 = vector.broadcast %cst_57 : f32 to vector<1x128xf32>
    %173 = arith.mulf %171, %172 : vector<1x128xf32>
    %cst_58 = arith.constant 1.000000e+00 : f32
    %174 = vector.broadcast %cst_58 : f32 to vector<1x128xf32>
    %175 = arith.subf %173, %174 : vector<1x128xf32>
    %cst_59 = arith.constant 5.000000e-01 : f32
    %176 = vector.broadcast %cst_59 : f32 to vector<1x128xf32>
    %177 = arith.mulf %175, %176 : vector<1x128xf32>
    %cst_60 = arith.constant 1.000000e+00 : f32
    %178 = vector.broadcast %cst_60 : f32 to vector<1x128xf32>
    %179 = arith.addf %169, %178 : vector<1x128xf32>
    %cst_61 = arith.constant 1.600000e+01 : f32
    %180 = vector.broadcast %cst_61 : f32 to vector<1x128xf32>
    %181 = arith.mulf %179, %180 : vector<1x128xf32>
    %cst_62 = arith.constant 1.000000e+00 : f32
    %182 = vector.broadcast %cst_62 : f32 to vector<1x128xf32>
    %183 = arith.subf %181, %182 : vector<1x128xf32>
    %cst_63 = arith.constant 5.000000e-01 : f32
    %184 = vector.broadcast %cst_63 : f32 to vector<1x128xf32>
    %185 = arith.mulf %183, %184 : vector<1x128xf32>
    %186 = math.floor %177 : vector<1x128xf32>
    %187 = math.floor %185 : vector<1x128xf32>
    %188 = arith.subf %177, %186 : vector<1x128xf32>
    %189 = arith.subf %185, %187 : vector<1x128xf32>
    %190 = arith.fptosi %186 : vector<1x128xf32> to vector<1x128xi32>
    %191 = arith.fptosi %187 : vector<1x128xf32> to vector<1x128xi32>
    %192 = vector.broadcast %191 : vector<1x128xi32> to vector<16x128xi32>
    %193 = arith.cmpi eq, %145, %192 : vector<16x128xi32>
    %194 = arith.extui %193 : vector<16x128xi1> to vector<16x128xi32>
    %195 = arith.sitofp %194 : vector<16x128xi32> to vector<16x128xf32>
    %cst_64 = arith.constant 1.000000e+00 : f32
    %196 = vector.broadcast %cst_64 : f32 to vector<1x128xf32>
    %197 = arith.subf %196, %189 : vector<1x128xf32>
    %198 = vector.broadcast %197 : vector<1x128xf32> to vector<16x128xf32>
    %199 = arith.mulf %195, %198 : vector<16x128xf32>
    %c1_i32_65 = arith.constant 1 : i32
    %200 = vector.broadcast %c1_i32_65 : i32 to vector<1x128xi32>
    %201 = arith.addi %191, %200 : vector<1x128xi32>
    %202 = vector.broadcast %201 : vector<1x128xi32> to vector<16x128xi32>
    %203 = arith.cmpi eq, %145, %202 : vector<16x128xi32>
    %204 = arith.extui %203 : vector<16x128xi1> to vector<16x128xi32>
    %205 = arith.sitofp %204 : vector<16x128xi32> to vector<16x128xf32>
    %206 = vector.broadcast %189 : vector<1x128xf32> to vector<16x128xf32>
    %207 = arith.mulf %205, %206 : vector<16x128xf32>
    %208 = arith.addf %199, %207 : vector<16x128xf32>
    %c0_66 = arith.constant 0 : index
    %c0_67 = arith.constant 0 : index
    %c0_68 = arith.constant 0 : index
    %c0_69 = arith.constant 0 : index
    %209 = vector.load %arg8[%c0_66, %c0_67, %c0_68, %c0_69] : memref<1x3x128x16xf32, #tpu.memory_space<vmem>>, vector<1x1x128x16xf32>
    %210 = vector.shape_cast %209 : vector<1x1x128x16xf32> to vector<128x16xf32>
    %cst_70 = arith.constant dense<0.000000e+00> : vector<128x128xf32>
    %211 = tpu.matmul %210, %208, %cst_70 {dimension_numbers = #tpu.dot_dimension_numbers<[1], [0], [0], [1], [0, 0, 1, 1], [], []>} : vector<128x16xf32>, vector<16x128xf32>, vector<128x128xf32> -> vector<128x128xf32>
    %212 = vector.broadcast %190 : vector<1x128xi32> to vector<16x128xi32>
    %213 = arith.cmpi eq, %146, %212 : vector<16x128xi32>
    %214 = arith.extui %213 : vector<16x128xi1> to vector<16x128xi32>
    %215 = arith.sitofp %214 : vector<16x128xi32> to vector<16x128xf32>
    %cst_71 = arith.constant 1.000000e+00 : f32
    %216 = vector.broadcast %cst_71 : f32 to vector<1x128xf32>
    %217 = arith.subf %216, %188 : vector<1x128xf32>
    %218 = vector.broadcast %217 : vector<1x128xf32> to vector<16x128xf32>
    %219 = arith.mulf %215, %218 : vector<16x128xf32>
    %c1_i32_72 = arith.constant 1 : i32
    %220 = vector.broadcast %c1_i32_72 : i32 to vector<1x128xi32>
    %221 = arith.addi %190, %220 : vector<1x128xi32>
    %222 = vector.broadcast %221 : vector<1x128xi32> to vector<16x128xi32>
    %223 = arith.cmpi eq, %146, %222 : vector<16x128xi32>
    %224 = arith.extui %223 : vector<16x128xi1> to vector<16x128xi32>
    %225 = arith.sitofp %224 : vector<16x128xi32> to vector<16x128xf32>
    %226 = vector.broadcast %188 : vector<1x128xf32> to vector<16x128xf32>
    %227 = arith.mulf %225, %226 : vector<16x128xf32>
    %228 = arith.addf %219, %227 : vector<16x128xf32>
    %cst_73 = arith.constant dense<0.000000e+00> : vector<128x128xf32>
    %229 = tpu.matmul %141, %228, %cst_73 {dimension_numbers = #tpu.dot_dimension_numbers<[1], [0], [0], [1], [0, 0, 1, 1], [], []>} : vector<128x16xf32>, vector<16x128xf32>, vector<128x128xf32> -> vector<128x128xf32>
    %230 = arith.mulf %211, %229 : vector<128x128xf32>
    %cst_74 = arith.constant dense<0.000000e+00> : vector<8x128xf32>
    %231 = tpu.matmul %140, %230, %cst_74 {dimension_numbers = #tpu.dot_dimension_numbers<[1], [0], [0], [1], [0, 0, 1, 1], [], []>} : vector<8x128xf32>, vector<128x128xf32>, vector<8x128xf32> -> vector<8x128xf32>
    %232 = arith.addf %147, %231 : vector<8x128xf32>
    %c2_75 = arith.constant 2 : index
    %c0_76 = arith.constant 0 : index
    %233 = memref.load %arg2[%c2_75, %c0_76] : memref<6x3xf32, #tpu.memory_space<smem>>
    %234 = vector.broadcast %233 : f32 to vector<1x128xf32>
    %235 = arith.mulf %234, %142 : vector<1x128xf32>
    %c2_77 = arith.constant 2 : index
    %c1_78 = arith.constant 1 : index
    %236 = memref.load %arg2[%c2_77, %c1_78] : memref<6x3xf32, #tpu.memory_space<smem>>
    %237 = vector.broadcast %236 : f32 to vector<1x128xf32>
    %238 = arith.mulf %237, %143 : vector<1x128xf32>
    %239 = arith.addf %235, %238 : vector<1x128xf32>
    %c2_79 = arith.constant 2 : index
    %c2_80 = arith.constant 2 : index
    %240 = memref.load %arg2[%c2_79, %c2_80] : memref<6x3xf32, #tpu.memory_space<smem>>
    %241 = vector.broadcast %240 : f32 to vector<1x128xf32>
    %242 = arith.mulf %241, %144 : vector<1x128xf32>
    %243 = arith.addf %239, %242 : vector<1x128xf32>
    %c3 = arith.constant 3 : index
    %c0_81 = arith.constant 0 : index
    %244 = memref.load %arg2[%c3, %c0_81] : memref<6x3xf32, #tpu.memory_space<smem>>
    %245 = vector.broadcast %244 : f32 to vector<1x128xf32>
    %246 = arith.mulf %245, %142 : vector<1x128xf32>
    %c3_82 = arith.constant 3 : index
    %c1_83 = arith.constant 1 : index
    %247 = memref.load %arg2[%c3_82, %c1_83] : memref<6x3xf32, #tpu.memory_space<smem>>
    %248 = vector.broadcast %247 : f32 to vector<1x128xf32>
    %249 = arith.mulf %248, %143 : vector<1x128xf32>
    %250 = arith.addf %246, %249 : vector<1x128xf32>
    %c3_84 = arith.constant 3 : index
    %c2_85 = arith.constant 2 : index
    %251 = memref.load %arg2[%c3_84, %c2_85] : memref<6x3xf32, #tpu.memory_space<smem>>
    %252 = vector.broadcast %251 : f32 to vector<1x128xf32>
    %253 = arith.mulf %252, %144 : vector<1x128xf32>
    %254 = arith.addf %250, %253 : vector<1x128xf32>
    %cst_86 = arith.constant 1.000000e+00 : f32
    %255 = vector.broadcast %cst_86 : f32 to vector<1x128xf32>
    %256 = arith.addf %243, %255 : vector<1x128xf32>
    %cst_87 = arith.constant 1.600000e+01 : f32
    %257 = vector.broadcast %cst_87 : f32 to vector<1x128xf32>
    %258 = arith.mulf %256, %257 : vector<1x128xf32>
    %cst_88 = arith.constant 1.000000e+00 : f32
    %259 = vector.broadcast %cst_88 : f32 to vector<1x128xf32>
    %260 = arith.subf %258, %259 : vector<1x128xf32>
    %cst_89 = arith.constant 5.000000e-01 : f32
    %261 = vector.broadcast %cst_89 : f32 to vector<1x128xf32>
    %262 = arith.mulf %260, %261 : vector<1x128xf32>
    %cst_90 = arith.constant 1.000000e+00 : f32
    %263 = vector.broadcast %cst_90 : f32 to vector<1x128xf32>
    %264 = arith.addf %254, %263 : vector<1x128xf32>
    %cst_91 = arith.constant 1.600000e+01 : f32
    %265 = vector.broadcast %cst_91 : f32 to vector<1x128xf32>
    %266 = arith.mulf %264, %265 : vector<1x128xf32>
    %cst_92 = arith.constant 1.000000e+00 : f32
    %267 = vector.broadcast %cst_92 : f32 to vector<1x128xf32>
    %268 = arith.subf %266, %267 : vector<1x128xf32>
    %cst_93 = arith.constant 5.000000e-01 : f32
    %269 = vector.broadcast %cst_93 : f32 to vector<1x128xf32>
    %270 = arith.mulf %268, %269 : vector<1x128xf32>
    %271 = math.floor %262 : vector<1x128xf32>
    %272 = math.floor %270 : vector<1x128xf32>
    %273 = arith.subf %262, %271 : vector<1x128xf32>
    %274 = arith.subf %270, %272 : vector<1x128xf32>
    %275 = arith.fptosi %271 : vector<1x128xf32> to vector<1x128xi32>
    %276 = arith.fptosi %272 : vector<1x128xf32> to vector<1x128xi32>
    %277 = vector.broadcast %276 : vector<1x128xi32> to vector<16x128xi32>
    %278 = arith.cmpi eq, %145, %277 : vector<16x128xi32>
    %279 = arith.extui %278 : vector<16x128xi1> to vector<16x128xi32>
    %280 = arith.sitofp %279 : vector<16x128xi32> to vector<16x128xf32>
    %cst_94 = arith.constant 1.000000e+00 : f32
    %281 = vector.broadcast %cst_94 : f32 to vector<1x128xf32>
    %282 = arith.subf %281, %274 : vector<1x128xf32>
    %283 = vector.broadcast %282 : vector<1x128xf32> to vector<16x128xf32>
    %284 = arith.mulf %280, %283 : vector<16x128xf32>
    %c1_i32_95 = arith.constant 1 : i32
    %285 = vector.broadcast %c1_i32_95 : i32 to vector<1x128xi32>
    %286 = arith.addi %276, %285 : vector<1x128xi32>
    %287 = vector.broadcast %286 : vector<1x128xi32> to vector<16x128xi32>
    %288 = arith.cmpi eq, %145, %287 : vector<16x128xi32>
    %289 = arith.extui %288 : vector<16x128xi1> to vector<16x128xi32>
    %290 = arith.sitofp %289 : vector<16x128xi32> to vector<16x128xf32>
    %291 = vector.broadcast %274 : vector<1x128xf32> to vector<16x128xf32>
    %292 = arith.mulf %290, %291 : vector<16x128xf32>
    %293 = arith.addf %284, %292 : vector<16x128xf32>
    %c0_96 = arith.constant 0 : index
    %c1_97 = arith.constant 1 : index
    %c0_98 = arith.constant 0 : index
    %c0_99 = arith.constant 0 : index
    %294 = vector.load %arg8[%c0_96, %c1_97, %c0_98, %c0_99] : memref<1x3x128x16xf32, #tpu.memory_space<vmem>>, vector<1x1x128x16xf32>
    %295 = vector.shape_cast %294 : vector<1x1x128x16xf32> to vector<128x16xf32>
    %cst_100 = arith.constant dense<0.000000e+00> : vector<128x128xf32>
    %296 = tpu.matmul %295, %293, %cst_100 {dimension_numbers = #tpu.dot_dimension_numbers<[1], [0], [0], [1], [0, 0, 1, 1], [], []>} : vector<128x16xf32>, vector<16x128xf32>, vector<128x128xf32> -> vector<128x128xf32>
    %297 = vector.broadcast %275 : vector<1x128xi32> to vector<16x128xi32>
    %298 = arith.cmpi eq, %146, %297 : vector<16x128xi32>
    %299 = arith.extui %298 : vector<16x128xi1> to vector<16x128xi32>
    %300 = arith.sitofp %299 : vector<16x128xi32> to vector<16x128xf32>
    %cst_101 = arith.constant 1.000000e+00 : f32
    %301 = vector.broadcast %cst_101 : f32 to vector<1x128xf32>
    %302 = arith.subf %301, %273 : vector<1x128xf32>
    %303 = vector.broadcast %302 : vector<1x128xf32> to vector<16x128xf32>
    %304 = arith.mulf %300, %303 : vector<16x128xf32>
    %c1_i32_102 = arith.constant 1 : i32
    %305 = vector.broadcast %c1_i32_102 : i32 to vector<1x128xi32>
    %306 = arith.addi %275, %305 : vector<1x128xi32>
    %307 = vector.broadcast %306 : vector<1x128xi32> to vector<16x128xi32>
    %308 = arith.cmpi eq, %146, %307 : vector<16x128xi32>
    %309 = arith.extui %308 : vector<16x128xi1> to vector<16x128xi32>
    %310 = arith.sitofp %309 : vector<16x128xi32> to vector<16x128xf32>
    %311 = vector.broadcast %273 : vector<1x128xf32> to vector<16x128xf32>
    %312 = arith.mulf %310, %311 : vector<16x128xf32>
    %313 = arith.addf %304, %312 : vector<16x128xf32>
    %cst_103 = arith.constant dense<0.000000e+00> : vector<128x128xf32>
    %314 = tpu.matmul %141, %313, %cst_103 {dimension_numbers = #tpu.dot_dimension_numbers<[1], [0], [0], [1], [0, 0, 1, 1], [], []>} : vector<128x16xf32>, vector<16x128xf32>, vector<128x128xf32> -> vector<128x128xf32>
    %315 = arith.mulf %296, %314 : vector<128x128xf32>
    %cst_104 = arith.constant dense<0.000000e+00> : vector<8x128xf32>
    %316 = tpu.matmul %140, %315, %cst_104 {dimension_numbers = #tpu.dot_dimension_numbers<[1], [0], [0], [1], [0, 0, 1, 1], [], []>} : vector<8x128xf32>, vector<128x128xf32>, vector<8x128xf32> -> vector<8x128xf32>
    %317 = arith.addf %232, %316 : vector<8x128xf32>
    %c4 = arith.constant 4 : index
    %c0_105 = arith.constant 0 : index
    %318 = memref.load %arg2[%c4, %c0_105] : memref<6x3xf32, #tpu.memory_space<smem>>
    %319 = vector.broadcast %318 : f32 to vector<1x128xf32>
    %320 = arith.mulf %319, %142 : vector<1x128xf32>
    %c4_106 = arith.constant 4 : index
    %c1_107 = arith.constant 1 : index
    %321 = memref.load %arg2[%c4_106, %c1_107] : memref<6x3xf32, #tpu.memory_space<smem>>
    %322 = vector.broadcast %321 : f32 to vector<1x128xf32>
    %323 = arith.mulf %322, %143 : vector<1x128xf32>
    %324 = arith.addf %320, %323 : vector<1x128xf32>
    %c4_108 = arith.constant 4 : index
    %c2_109 = arith.constant 2 : index
    %325 = memref.load %arg2[%c4_108, %c2_109] : memref<6x3xf32, #tpu.memory_space<smem>>
    %326 = vector.broadcast %325 : f32 to vector<1x128xf32>
    %327 = arith.mulf %326, %144 : vector<1x128xf32>
    %328 = arith.addf %324, %327 : vector<1x128xf32>
    %c5 = arith.constant 5 : index
    %c0_110 = arith.constant 0 : index
    %329 = memref.load %arg2[%c5, %c0_110] : memref<6x3xf32, #tpu.memory_space<smem>>
    %330 = vector.broadcast %329 : f32 to vector<1x128xf32>
    %331 = arith.mulf %330, %142 : vector<1x128xf32>
    %c5_111 = arith.constant 5 : index
    %c1_112 = arith.constant 1 : index
    %332 = memref.load %arg2[%c5_111, %c1_112] : memref<6x3xf32, #tpu.memory_space<smem>>
    %333 = vector.broadcast %332 : f32 to vector<1x128xf32>
    %334 = arith.mulf %333, %143 : vector<1x128xf32>
    %335 = arith.addf %331, %334 : vector<1x128xf32>
    %c5_113 = arith.constant 5 : index
    %c2_114 = arith.constant 2 : index
    %336 = memref.load %arg2[%c5_113, %c2_114] : memref<6x3xf32, #tpu.memory_space<smem>>
    %337 = vector.broadcast %336 : f32 to vector<1x128xf32>
    %338 = arith.mulf %337, %144 : vector<1x128xf32>
    %339 = arith.addf %335, %338 : vector<1x128xf32>
    %cst_115 = arith.constant 1.000000e+00 : f32
    %340 = vector.broadcast %cst_115 : f32 to vector<1x128xf32>
    %341 = arith.addf %328, %340 : vector<1x128xf32>
    %cst_116 = arith.constant 1.600000e+01 : f32
    %342 = vector.broadcast %cst_116 : f32 to vector<1x128xf32>
    %343 = arith.mulf %341, %342 : vector<1x128xf32>
    %cst_117 = arith.constant 1.000000e+00 : f32
    %344 = vector.broadcast %cst_117 : f32 to vector<1x128xf32>
    %345 = arith.subf %343, %344 : vector<1x128xf32>
    %cst_118 = arith.constant 5.000000e-01 : f32
    %346 = vector.broadcast %cst_118 : f32 to vector<1x128xf32>
    %347 = arith.mulf %345, %346 : vector<1x128xf32>
    %cst_119 = arith.constant 1.000000e+00 : f32
    %348 = vector.broadcast %cst_119 : f32 to vector<1x128xf32>
    %349 = arith.addf %339, %348 : vector<1x128xf32>
    %cst_120 = arith.constant 1.600000e+01 : f32
    %350 = vector.broadcast %cst_120 : f32 to vector<1x128xf32>
    %351 = arith.mulf %349, %350 : vector<1x128xf32>
    %cst_121 = arith.constant 1.000000e+00 : f32
    %352 = vector.broadcast %cst_121 : f32 to vector<1x128xf32>
    %353 = arith.subf %351, %352 : vector<1x128xf32>
    %cst_122 = arith.constant 5.000000e-01 : f32
    %354 = vector.broadcast %cst_122 : f32 to vector<1x128xf32>
    %355 = arith.mulf %353, %354 : vector<1x128xf32>
    %356 = math.floor %347 : vector<1x128xf32>
    %357 = math.floor %355 : vector<1x128xf32>
    %358 = arith.subf %347, %356 : vector<1x128xf32>
    %359 = arith.subf %355, %357 : vector<1x128xf32>
    %360 = arith.fptosi %356 : vector<1x128xf32> to vector<1x128xi32>
    %361 = arith.fptosi %357 : vector<1x128xf32> to vector<1x128xi32>
    %362 = vector.broadcast %361 : vector<1x128xi32> to vector<16x128xi32>
    %363 = arith.cmpi eq, %145, %362 : vector<16x128xi32>
    %364 = arith.extui %363 : vector<16x128xi1> to vector<16x128xi32>
    %365 = arith.sitofp %364 : vector<16x128xi32> to vector<16x128xf32>
    %cst_123 = arith.constant 1.000000e+00 : f32
    %366 = vector.broadcast %cst_123 : f32 to vector<1x128xf32>
    %367 = arith.subf %366, %359 : vector<1x128xf32>
    %368 = vector.broadcast %367 : vector<1x128xf32> to vector<16x128xf32>
    %369 = arith.mulf %365, %368 : vector<16x128xf32>
    %c1_i32_124 = arith.constant 1 : i32
    %370 = vector.broadcast %c1_i32_124 : i32 to vector<1x128xi32>
    %371 = arith.addi %361, %370 : vector<1x128xi32>
    %372 = vector.broadcast %371 : vector<1x128xi32> to vector<16x128xi32>
    %373 = arith.cmpi eq, %145, %372 : vector<16x128xi32>
    %374 = arith.extui %373 : vector<16x128xi1> to vector<16x128xi32>
    %375 = arith.sitofp %374 : vector<16x128xi32> to vector<16x128xf32>
    %376 = vector.broadcast %359 : vector<1x128xf32> to vector<16x128xf32>
    %377 = arith.mulf %375, %376 : vector<16x128xf32>
    %378 = arith.addf %369, %377 : vector<16x128xf32>
    %c0_125 = arith.constant 0 : index
    %c2_126 = arith.constant 2 : index
    %c0_127 = arith.constant 0 : index
    %c0_128 = arith.constant 0 : index
    %379 = vector.load %arg8[%c0_125, %c2_126, %c0_127, %c0_128] : memref<1x3x128x16xf32, #tpu.memory_space<vmem>>, vector<1x1x128x16xf32>
    %380 = vector.shape_cast %379 : vector<1x1x128x16xf32> to vector<128x16xf32>
    %cst_129 = arith.constant dense<0.000000e+00> : vector<128x128xf32>
    %381 = tpu.matmul %380, %378, %cst_129 {dimension_numbers = #tpu.dot_dimension_numbers<[1], [0], [0], [1], [0, 0, 1, 1], [], []>} : vector<128x16xf32>, vector<16x128xf32>, vector<128x128xf32> -> vector<128x128xf32>
    %382 = vector.broadcast %360 : vector<1x128xi32> to vector<16x128xi32>
    %383 = arith.cmpi eq, %146, %382 : vector<16x128xi32>
    %384 = arith.extui %383 : vector<16x128xi1> to vector<16x128xi32>
    %385 = arith.sitofp %384 : vector<16x128xi32> to vector<16x128xf32>
    %cst_130 = arith.constant 1.000000e+00 : f32
    %386 = vector.broadcast %cst_130 : f32 to vector<1x128xf32>
    %387 = arith.subf %386, %358 : vector<1x128xf32>
    %388 = vector.broadcast %387 : vector<1x128xf32> to vector<16x128xf32>
    %389 = arith.mulf %385, %388 : vector<16x128xf32>
    %c1_i32_131 = arith.constant 1 : i32
    %390 = vector.broadcast %c1_i32_131 : i32 to vector<1x128xi32>
    %391 = arith.addi %360, %390 : vector<1x128xi32>
    %392 = vector.broadcast %391 : vector<1x128xi32> to vector<16x128xi32>
    %393 = arith.cmpi eq, %146, %392 : vector<16x128xi32>
    %394 = arith.extui %393 : vector<16x128xi1> to vector<16x128xi32>
    %395 = arith.sitofp %394 : vector<16x128xi32> to vector<16x128xf32>
    %396 = vector.broadcast %358 : vector<1x128xf32> to vector<16x128xf32>
    %397 = arith.mulf %395, %396 : vector<16x128xf32>
    %398 = arith.addf %389, %397 : vector<16x128xf32>
    %cst_132 = arith.constant dense<0.000000e+00> : vector<128x128xf32>
    %399 = tpu.matmul %141, %398, %cst_132 {dimension_numbers = #tpu.dot_dimension_numbers<[1], [0], [0], [1], [0, 0, 1, 1], [], []>} : vector<128x16xf32>, vector<16x128xf32>, vector<128x128xf32> -> vector<128x128xf32>
    %400 = arith.mulf %381, %399 : vector<128x128xf32>
    %cst_133 = arith.constant dense<0.000000e+00> : vector<8x128xf32>
    %401 = tpu.matmul %140, %400, %cst_133 {dimension_numbers = #tpu.dot_dimension_numbers<[1], [0], [0], [1], [0, 0, 1, 1], [], []>} : vector<8x128xf32>, vector<128x128xf32>, vector<8x128xf32> -> vector<8x128xf32>
    %402 = arith.addf %317, %401 : vector<8x128xf32>
    %403 = tpu.concatenate %139, %402 in 0 : vector<8x128xf32>, vector<8x128xf32> -> vector<16x128xf32>
    %404 = vector.shape_cast %403 : vector<16x128xf32> to vector<1x16x128xf32>
    %c0_134 = arith.constant 0 : index
    %c0_135 = arith.constant 0 : index
    %c0_136 = arith.constant 0 : index
    %405 = vector.load %arg10[%c0_134, %c0_135, %c0_136] : memref<1x16x128xf32, #tpu.memory_space<vmem>>, vector<1x16x128xf32>
    tpu.vector_store %arg10[%c0_134, %c0_135, %c0_136], %404 {strides = array<i32>} : memref<1x16x128xf32, #tpu.memory_space<vmem>>, vector<1x16x128xf32>,
    return
  }
  func.func @transform_0(%arg0: i32, %arg1: i32) -> (i32, i32) {
    %c0_i32 = arith.constant 0 : i32
    %c0_i32_0 = arith.constant 0 : i32
    %c0_i32_1 = arith.constant 0 : i32
    return %c0_i32, %c0_i32_0 : i32, i32
  }
  func.func @transform_1(%arg0: i32, %arg1: i32) -> (i32, i32) {
    %c0_i32 = arith.constant 0 : i32
    %c0_i32_0 = arith.constant 0 : i32
    %c0_i32_1 = arith.constant 0 : i32
    return %c0_i32, %c0_i32_0 : i32, i32
  }
  func.func @transform_2(%arg0: i32, %arg1: i32) -> (i32, i32) {
    %c0_i32 = arith.constant 0 : i32
    %c0_i32_0 = arith.constant 0 : i32
    %c0_i32_1 = arith.constant 0 : i32
    return %c0_i32, %c0_i32_0 : i32, i32
  }
  func.func @transform_3(%arg0: i32, %arg1: i32) -> (i32, i32) {
    %c0_i32 = arith.constant 0 : i32
    %c0_i32_0 = arith.constant 0 : i32
    %c0_i32_1 = arith.constant 0 : i32
    return %c0_i32, %c0_i32_0 : i32, i32
  }
  func.func @transform_4(%arg0: i32, %arg1: i32) -> (i32, i32) {
    %c0_i32 = arith.constant 0 : i32
    %c0_i32_0 = arith.constant 0 : i32
    %c0_i32_1 = arith.constant 0 : i32
    return %c0_i32, %c0_i32_0 : i32, i32
  }
  func.func @transform_5(%arg0: i32, %arg1: i32) -> (i32, i32, i32) {
    %c0_i32 = arith.constant 0 : i32
    %c0_i32_0 = arith.constant 0 : i32
    return %arg0, %c0_i32, %arg1 : i32, i32, i32
  }
  func.func @transform_6(%arg0: i32, %arg1: i32) -> (i32, i32, i32, i32) {
    %c0_i32 = arith.constant 0 : i32
    %c0_i32_0 = arith.constant 0 : i32
    %c0_i32_1 = arith.constant 0 : i32
    %c0_i32_2 = arith.constant 0 : i32
    return %arg0, %c0_i32, %c0_i32_0, %c0_i32_1 : i32, i32, i32, i32
  }
  func.func @transform_7(%arg0: i32, %arg1: i32) -> (i32, i32, i32) {
    %c0_i32 = arith.constant 0 : i32
    %c0_i32_0 = arith.constant 0 : i32
    %c0_i32_1 = arith.constant 0 : i32
    return %arg0, %c0_i32, %c0_i32_0 : i32, i32, i32
  }
  func.func @transform_8(%arg0: i32, %arg1: i32) -> (i32, i32, i32) {
    %c0_i32 = arith.constant 0 : i32
    %c0_i32_0 = arith.constant 0 : i32
    return %arg0, %c0_i32, %arg1 : i32, i32, i32
  }
}

</mosaic_0001>

<bundles_post_ra>
// kernel: tpu_custom_call.1
= control target key start
LH: loop header
LB: loop body
LE: loop exit
PB: predicated region body
PF: predicated region fallthrough
CT: control target
= control target key end

     0   :  { %13 = vsyncpa [#allocation4], 0  ;;  %s4941_s0 = inlined_call_operand.vmem [shape: f32[6,3], index: 0, kind: input, shape index: {}]   ;;  %s4942_s1 = inlined_call_operand.vmem [shape: f32[8,128], index: 1, kind: input, shape index: {}]   ;;  %s4943_s2 = inlined_call_operand.vmem [shape: f32[128,16], index: 2, kind: input, shape index: {}]   ;;  %s4944_s3 = inlined_call_operand.vmem [shape: f32[8,64], index: 3, kind: input, shape index: {}]   ;;  %s4945_s4 = inlined_call_operand.vmem [shape: f32[64,8], index: 4, kind: input, shape index: {}]   ;;  %s4946_s5 = inlined_call_operand.vmem [shape: f32[2,3,128], index: 5, kind: input, shape index: {}]   ;;  %s4947_s6 = inlined_call_operand.vmem [shape: f32[2,3,128,16], index: 6, kind: input, shape index: {}]   ;;  %s4948_s7 = inlined_call_operand.vmem [shape: f32[2,64,64], index: 7, kind: input, shape index: {}]   ;;  %s4949_s8 = inlined_call_operand.hbm [shape: f32[2,16,128], index: 8, kind: output, shape index: {}]  }
   0x1   :  { %14 = vsyncpa [#allocation3], 0 }
   0x2   :  { %16 = vsyncpa [#allocation3 + $0x1], 0  ;;  %s4005_s27 = smov 0   ;;  %s4007_s28 = smov 0  }
   0x3   :  { %s4009_s29 = smov 0   ;;  %s4011_s30 = smov 0  }
   0x4   :  { %s4013_s9 = smov 0   ;;  %s4015_s10 = smov 0  }
   0x5 LB: > { %s2868_s11 = sadd.s32 4294967295, %s3951_s10   ;;  %s2869_s12 = sadd.s32 4294967294, %s3951_s10   ;;  %s3951_s10 = sphi %s4015_s10, %s22_s10   ;;  %s3947_s9 = sphi %s4013_s9, %s4990_s9   ;;  %s3943_s30 = sphi %s4011_s30, %s4989_s30   ;;  %s3939_s29 = sphi %s4009_s29, %s4988_s29   ;;  %s3935_s28 = sphi %s4007_s28, %s4987_s28   ;;  %s3931_s27 = sphi %s4005_s27, %s4986_s27  }
   0x6   : > { %s34_s13 = sadd.s32 1, %s3947_s9  ;;  %s228_s14 = sadd.s32 1, %s3939_s29 }
   0x7   : > { %p36_p0 = scmp.ge.s32.totalorder %s34_s13, 2  ;;  %p238_p1 = scmp.ne.s32.totalorder %s3939_s29, %s3935_s28 }
   0x8   : > { %p239_p2 = scmp.eq.s32.totalorder %s2868_s11, 1  ;;  %p244_p3 = scmp.ne.s32.totalorder %s3935_s28, %s3931_s27 }
   0x9   : > { %s4992_s13 = smov (%p36_p0, %s34_s13), 0  ;;  %p245_p5 = scmp.eq.s32.totalorder %s2869_s12, 1 }
   0xa   : > { %p4045_p4 = por %p239_p2, %p238_p1  ;;  %s223_s16 = ssub.s32 %s3947_s9, %s4992_s13 }
   0xb   : > { %p2870_p6 = scmp.ge.s32.totalorder %s3951_s10, 1  ;;  %p226_p7 = scmp.eq.s32.totalorder %s223_s16, 0 }
   0xc   : > { %p4052_p8 = por %p245_p5, %p244_p3  ;;  %p252_p9 = scmp.lt.s32.totalorder %s3951_s10, 3 }
   0xd   : > { %s4058_s18 = scalar_select %p226_p7, %s3939_s29, %s228_s14  }
   0xe   : > { %p4060_p10 = pnand %p2870_p6, %p252_p9  ;;  %p4064_p11 = scmp.eq.s32.totalorder %s2868_s11, 0 }
   0xf   : > { %s265_s23 = sshll.u32 %s4941_s0, 4  ;;  %s266_s23 = int_to_ptr.vmem [resolvable:$true] %s265_s23 }
  0x10   : > { %p3788_p12 = pneg %p4060_p10  ;;  %s3854_s24 = scalar_lea.vmem %s266_s23, 128 }
  0x11   : > { %p3855_p0 = scmp.ne.s32.totalorder %s266_s23, %s3854_s24  ;;  %p3862_p5 = scmp.lt.s32.totalorder %s266_s23, %s266_s23 }
  0x12   : > { %p3789_p13 = pnand %p4064_p11, %p3788_p12  ;;  %p3863_p6 = scmp.lt.s32.totalorder %s3854_s24, %s3854_s24 }
  0x14   : > { %p3856_p1 = pneg %p3789_p13  ;;  %p3864_p7 = por %p3863_p6, %p3862_p5 }
  0x16   : > { %p3857_p2 = pnand %p3856_p1, %p3855_p0 }
  0x18   : > { %p3858_p3 = pneg %p3857_p2 }
  0x1a   : > { %p3865_p9 = pnand %p3864_p7, %p3858_p3 }
  0x1c   : > { %3868 = shalt.err (!%p3865_p9)
}
  0x1d   : > { %s3953_s25 = smov [#allocation2]   ;;  %316 = sbr.rel (%p4060_p10) target bundleno = 1106 (0x452), region = 52 }
  0x1e   : > { %3791 = dma.vmem_to_smem (!%p3789_p13), %s266_s23, 128, %s3953_s25, [#allocation4]  }
  0x24   : > { %3922 = dma.done.wait (%p4064_p11), [#allocation4], 128  }
  0x25   : > { %3924 = vsyncadd (%p4064_p11), [#allocation4], 4294967168 }
  0x26   : > { %322 = sfence }
  0x27   : > { %p363_p12 = scmp.lt.s32.totalorder %s3943_s30, 1  ;;  %v382_v0 = vld [vmem:[%s4945_s4] sm:$0xff]  ;;  %vm780_vm0 = vcmask 64512   ;;  %vm625_vm1 = vcmask 523264   ;;  %v413_v5 = vlaneseq  ;;  %v4950_v49 = vmov 0.0   ;;  %s2931_s19 = sld [smem:[#allocation2 + $0x1]] }
  0x28   : > { %3336 = vmatprep.mubr.msk.f32.mxu1 %vm780_vm0, %v382_v0  ;;  %s2932_s22 = sld [smem:[#allocation2 + $0x2]]  ;;  %s2979_s23 = sld [smem:[#allocation2 + $0x101]] }
  0x29   : > { %s4087_s12 = scalar_select %p363_p12, %s3943_s30, 1  ;;  %v4107_v8 = vshrl.u32 %v413_v5, 7 }
  0x2a   : > { %s2980_s25 = sld [smem:[#allocation2 + $0x102]]  ;;  %s2933_s16 = sld [smem:[#allocation2 + $0x80]] }
  0x2b   : > { %s2876_s14 = sshll.u32 %s4087_s12, 2  ;;  %s3111_s21 = sshll.u32 %s4087_s12, 6  ;;  %v4115_v13 = vadd.s32 8, %v4107_v8  ;;  %v427_v14 = vsub.s32 2, %v4107_v8  ;;  %v4121_v18 = vadd.s32 16, %v4107_v8  ;;  %v4124_v20 = vadd.s32 24, %v4107_v8 }
  0x2c   : > { %s4093_s20 = scalar_lea.vmem %s4946_s5, %s2876_s14  ;;  %s4102_s24 = scalar_lea.vmem %s4948_s7, %s3111_s21  ;;  %v4127_v21 = vadd.s32 32, %v4107_v8  ;;  %v4130_v22 = vsub.s32 0, %v4107_v8  ;;  %v4133_v23 = vadd.s32 40, %v4107_v8  ;;  %v4136_v24 = vadd.s32 48, %v4107_v8 }
  0x2d   : > { %v4097_v1 = vld [vmem:[%s4093_s20] sm:$0x7]  ;;  %v4141_v31 = vadd.s32 56, %v4107_v8  ;;  %s1008_s21 = sld [smem:[#allocation2]]  ;;  %s2934_s14 = sld [smem:[#allocation2 + $0x81]] }
  0x2e   : > { %v398_v2 = vadd.f32 1.0, %v4097_v1  ;;  %v390_v3 = vld [vmem:[%s4102_s24] sm:$0xff] }
  0x2f   : > { %3322 = vmatprep.mubr.msk.f32.mxu0 %vm625_vm1, %v390_v3 }
  0x30   : > { %v399_v4 = vmul.f32 0.5, %v398_v2 }
  0x32   : > { %v400_v6 = vmul.f32 7.0, %v399_v4 }
  0x34   : > { %v401_v7 = vfloor.f32 %v400_v6 }
  0x36   : > { %v4109_v9 = vsub.f32 %v400_v6, %v401_v7  ;;  %v3768_v10 = vtrunc.f32 %v401_v7 }
  0x38   : > { %v3769_v11 = vcvt.f32.s32 %v3768_v10  ;;  %v4112_v12 = vsub.f32 1.0, %v4109_v9  ;;  %v501_v15 = vrot.slane %v4109_v9, 7  ;;  %v777_v39 = vrot.slane %v4109_v9, %v4130_v22 }
  0x3a   : > { %vm404_vm2 = vcmp.gt.s32.totalorder %v3769_v11, 0  ;;  %v408_v16 = vadd.s32 1, %v3769_v11  ;;  %v455_v17 = vrot.slane %v4112_v12, 7  ;;  %v503_v28 = vmul.f32 %v501_v15, %v4112_v12 }
  0x3b   : > { %v405_v19 = vsel %vm404_vm2, %v3769_v11, 0  ;;  %v604_v34 = vmul.f32 %v501_v15, %v4109_v9  ;;  %v765_v42 = vrot.slane %v4112_v12, %v4130_v22 }
  0x3c   : > { %vm406_vm3 = vcmp.lt.s32.totalorder %v405_v19, 7  ;;  %vm409_vm4 = vcmp.gt.s32.totalorder %v408_v16, 0  ;;  %v457_v27 = vmul.f32 %v455_v17, %v4112_v12  ;;  %v554_v33 = vmul.f32 %v455_v17, %v4109_v9  ;;  %v391_v9 = vld [vmem:[%s4102_s24 + $0x8] sm:$0xff] }
  0x3d   : > { %v407_v25 = vsel %vm406_vm3, %v405_v19, 7  ;;  %v410_v26 = vsel %vm409_vm4, %v408_v16, 0  ;;  %v4154_v41 = vrot.slane %v503_v28, %v427_v14  ;;  %v4163_v48 = vrot.slane %v604_v34, %v427_v14 }
  0x3e   : > { %vm411_vm5 = vcmp.lt.s32.totalorder %v410_v26, 7  ;;  %v422_v29 = vmul.u32 8, %v407_v25  ;;  %v423_v30 = vrot.slane %v407_v25, 7  ;;  %v758_v35 = vrot.slane %v407_v25, %v4130_v22 }
  0x3f   : > { %v4143_v32 = vsel %vm411_vm5, %v410_v26, 7  ;;  %v4152_v40 = vrot.slane %v457_v27, %v427_v14  ;;  %v4161_v47 = vrot.slane %v554_v33, %v427_v14 }
  0x40   : > { %v424_v36 = vadd.s32 %v423_v30, %v422_v29  ;;  %v470_v37 = vrot.slane %v4143_v32, 7  ;;  %v524_v38 = vmul.u32 8, %v4143_v32  ;;  %vm759_vm6 = vcmp.eq.s32.totalorder %v4107_v8, %v758_v35 }
  0x41   : > { %v4166_v50 = vsel %vm759_vm6, 1.0, %v4950_v49  ;;  %v770_v51 = vrot.slane %v4143_v32, %v4130_v22 }
  0x42   : > { %v4159_v43 = vrot.slane %v424_v36, %v427_v14  ;;  %v471_v44 = vadd.s32 %v470_v37, %v422_v29  ;;  %v525_v45 = vadd.s32 %v524_v38, %v423_v30  ;;  %v575_v46 = vadd.s32 %v524_v38, %v470_v37 }
  0x44   : > { %vm429_vm7 = vcmp.eq.s32.totalorder %v4107_v8, %v4159_v43  ;;  %vm430_vm8 = vcmp.eq.s32.totalorder %v4115_v13, %v4159_v43  ;;  %v4174_v52 = vrot.slane %v471_v44, %v427_v14  ;;  %v4176_v53 = vrot.slane %v525_v45, %v427_v14 }
  0x45   : > { %v2880_v54 = vsel %vm429_vm7, 1.0, %v4950_v49  ;;  %v2881_v55 = vsel %vm430_vm8, 1.0, %v4950_v49  ;;  %v4180_v56 = vrot.slane %v575_v46, %v427_v14  ;;  %vm431_vm9 = vcmp.eq.s32.totalorder %v4121_v18, %v4159_v43 }
  0x46   : > { %v462_v57 = vmul.f32 %v2880_v54, %v4152_v40  ;;  %v463_v58 = vmul.f32 %v2881_v55, %v4152_v40  ;;  %vm476_vm10 = vcmp.eq.s32.totalorder %v4107_v8, %v4174_v52  ;;  %vm477_vm11 = vcmp.eq.s32.totalorder %v4115_v13, %v4174_v52 }
  0x47   : > { %v2888_v59 = vsel %vm476_vm10, 1.0, %v4950_v49  ;;  %v2889_v60 = vsel %vm477_vm11, 1.0, %v4950_v49  ;;  %vm530_vm12 = vcmp.eq.s32.totalorder %v4107_v8, %v4176_v53  ;;  %vm531_vm13 = vcmp.eq.s32.totalorder %v4115_v13, %v4176_v53 }
  0x48   : > { %v508_v61 = vmul.f32 %v2888_v59, %v4154_v41  ;;  %v509_v62 = vmul.f32 %v2889_v60, %v4154_v41  ;;  %v2896_v63 = vsel %vm530_vm12, 1.0, %v4950_v49  ;;  %v2897_v0 = vsel %vm531_vm13, 1.0, %v4950_v49 }
  0x49   : > { %v559_v2 = vmul.f32 %v2896_v63, %v4161_v47  ;;  %v560_v3 = vmul.f32 %v2897_v0, %v4161_v47  ;;  %vm580_vm14 = vcmp.eq.s32.totalorder %v4107_v8, %v4180_v56  ;;  %vm581_vm15 = vcmp.eq.s32.totalorder %v4115_v13, %v4180_v56 }
  0x4a   : > { %v516_v4 = vadd.f32 %v508_v61, %v462_v57  ;;  %v517_v5 = vadd.f32 %v509_v62, %v463_v58  ;;  %v2904_v6 = vsel %vm580_vm14, 1.0, %v4950_v49  ;;  %v2905_v7 = vsel %vm581_vm15, 1.0, %v4950_v49 }
  0x4b   : > { %v609_v10 = vmul.f32 %v2904_v6, %v4163_v48  ;;  %v610_v11 = vmul.f32 %v2905_v7, %v4163_v48  ;;  %vm432_vm2 = vcmp.eq.s32.totalorder %v4124_v20, %v4159_v43  ;;  %v2882_v14 = vsel %vm431_vm9, 1.0, %v4950_v49 }
  0x4c   : > { %v567_v15 = vadd.f32 %v559_v2, %v516_v4  ;;  %v568_v16 = vadd.f32 %v560_v3, %v517_v5  ;;  %v2883_v17 = vsel %vm432_vm2, 1.0, %v4950_v49  ;;  %v464_v19 = vmul.f32 %v2882_v14, %v4152_v40 }
  0x4d   : > { %v465_v25 = vmul.f32 %v2883_v17, %v4152_v40  ;;  %vm478_vm3 = vcmp.eq.s32.totalorder %v4121_v18, %v4174_v52  ;;  %vm479_vm4 = vcmp.eq.s32.totalorder %v4124_v20, %v4174_v52  ;;  %vm532_vm5 = vcmp.eq.s32.totalorder %v4121_v18, %v4176_v53 }
  0x4e   : > { %v617_v26 = vadd.f32 %v609_v10, %v567_v15  ;;  %v618_v27 = vadd.f32 %v610_v11, %v568_v16  ;;  %v2890_v28 = vsel %vm478_vm3, 1.0, %v4950_v49  ;;  %v2891_v29 = vsel %vm479_vm4, 1.0, %v4950_v49 }
  0x4f   : > { %v510_v30 = vmul.f32 %v2890_v28, %v4154_v41  ;;  %v511_v33 = vmul.f32 %v2891_v29, %v4154_v41  ;;  %vm533_vm6 = vcmp.eq.s32.totalorder %v4124_v20, %v4176_v53  ;;  %v2898_v34 = vsel %vm532_vm5, 1.0, %v4950_v49 }
  0x50   : > { %v3640_v35 = vpack.c.bf16 %v618_v27, %v617_v26  ;;  %v2899_v36 = vsel %vm533_vm6, 1.0, %v4950_v49  ;;  %v561_v37 = vmul.f32 %v2898_v34, %v4161_v47  ;;  %vm582_vm7 = vcmp.eq.s32.totalorder %v4121_v18, %v4180_v56 }
  0x51   : > { %v518_v38 = vadd.f32 %v510_v30, %v464_v19  ;;  %v519_v44 = vadd.f32 %v511_v33, %v465_v25  ;;  %v562_v45 = vmul.f32 %v2899_v36, %v4161_v47  ;;  %vm583_vm8 = vcmp.eq.s32.totalorder %v4124_v20, %v4180_v56 }
  0x52   : > { %3641 = vmatprep.subr.bf16.mxu0 %v3640_v35  ;;  %v2906_v46 = vsel %vm582_vm7, 1.0, %v4950_v49  ;;  %v2907_v54 = vsel %vm583_vm8, 1.0, %v4950_v49  ;;  %vm433_vm9 = vcmp.eq.s32.totalorder %v4127_v21, %v4159_v43  ;;  %vm434_vm10 = vcmp.eq.s32.totalorder %v4133_v23, %v4159_v43 }
  0x53   : > { %3643 = vmatpush3.bf16.msra.mxu0 %v3640_v35  ;;  %v569_v18 = vadd.f32 %v561_v37, %v518_v38  ;;  %v570_v55 = vadd.f32 %v562_v45, %v519_v44  ;;  %v611_v57 = vmul.f32 %v2906_v46, %v4163_v48  ;;  %v612_v58 = vmul.f32 %v2907_v54, %v4163_v48 }
  0x54   : > { %v2884_v20 = vsel %vm433_vm9, 1.0, %v4950_v49  ;;  %v2885_v59 = vsel %vm434_vm10, 1.0, %v4950_v49  ;;  %vm480_vm11 = vcmp.eq.s32.totalorder %v4127_v21, %v4174_v52  ;;  %vm481_vm12 = vcmp.eq.s32.totalorder %v4133_v23, %v4174_v52 }
  0x55   : > { %v619_v60 = vadd.f32 %v611_v57, %v569_v18  ;;  %v620_v61 = vadd.f32 %v612_v58, %v570_v55  ;;  %v466_v62 = vmul.f32 %v2884_v20, %v4152_v40  ;;  %v467_v63 = vmul.f32 %v2885_v59, %v4152_v40  ;;  %v383_v55 = vld [vmem:[%s4945_s4 + $0x8] sm:$0xff]  ;;  %v384_v58 = vld [vmem:[%s4945_s4 + $0x10] sm:$0xff]  ;;  %v386_v20 = vld [vmem:[%s4945_s4 + $0x20] sm:$0xff] }
  0x56   : > { %v2892_v0 = vsel %vm480_vm11, 1.0, %v4950_v49  ;;  %v2893_v2 = vsel %vm481_vm12, 1.0, %v4950_v49  ;;  %vm534_vm13 = vcmp.eq.s32.totalorder %v4127_v21, %v4176_v53  ;;  %vm535_vm14 = vcmp.eq.s32.totalorder %v4133_v23, %v4176_v53  ;;  %v393_v59 = vld [vmem:[%s4102_s24 + $0x18] sm:$0xff] }
  0x57   : > { %v3644_v3 = vpack.c.bf16 %v620_v61, %v619_v60  ;;  %v512_v4 = vmul.f32 %v2892_v0, %v4154_v41  ;;  %v513_v5 = vmul.f32 %v2893_v2, %v4154_v41  ;;  %v2900_v6 = vsel %vm534_vm13, 1.0, %v4950_v49  ;;  %v387_v60 = vld [vmem:[%s4945_s4 + $0x28] sm:$0xff]  ;;  %v394_v61 = vld [vmem:[%s4102_s24 + $0x20] sm:$0xff]  ;;  %v389_v0 = vld [vmem:[%s4945_s4 + $0x38] sm:$0xff] }
  0x58   : > { %vm4268_vm15 = vcmp.eq.s32.totalorder %v4107_v8, %v770_v51  ;;  %v2901_v10 = vsel %vm535_vm14, 1.0, %v4950_v49  ;;  %v563_v11 = vmul.f32 %v2900_v6, %v4161_v47  ;;  %vm584_vm2 = vcmp.eq.s32.totalorder %v4127_v21, %v4180_v56  ;;  %v396_v2 = vld [vmem:[%s4102_s24 + $0x30] sm:$0xff] }
  0x59   : > { %vm585_vm3 = vcmp.eq.s32.totalorder %v4133_v23, %v4180_v56  ;;  %3645 = vmatprep.subr.bf16.mxu0 %v3644_v3  ;;  %v520_v14 = vadd.f32 %v512_v4, %v466_v62  ;;  %v521_v15 = vadd.f32 %v513_v5, %v467_v63  ;;  %v564_v32 = vmul.f32 %v2901_v10, %v4161_v47  ;;  %v388_v62 = vld [vmem:[%s4945_s4 + $0x30] sm:$0xff]  ;;  %v395_v63 = vld [vmem:[%s4102_s24 + $0x28] sm:$0xff] }
  0x5a   : > { %v2908_v51 = vsel %vm584_vm2, 1.0, %v4950_v49  ;;  %3647 = vmatpush3.bf16.msra.mxu0 %v3644_v3  ;;  %v2909_v16 = vsel %vm585_vm3, 1.0, %v4950_v49  ;;  %vm435_vm4 = vcmp.eq.s32.totalorder %v4136_v24, %v4159_v43  ;;  %vm436_vm5 = vcmp.eq.s32.totalorder %v4141_v31, %v4159_v43  ;;  %v397_v3 = vld [vmem:[%s4102_s24 + $0x38] sm:$0xff] }
  0x5b   : > { %v613_v17 = vmul.f32 %v2908_v51, %v4163_v48  ;;  %v571_v21 = vadd.f32 %v563_v11, %v520_v14  ;;  %v572_v23 = vadd.f32 %v564_v32, %v521_v15  ;;  %v614_v19 = vmul.f32 %v2909_v16, %v4163_v48 }
  0x5c   : > { %v2886_v25 = vsel %vm435_vm4, 1.0, %v4950_v49  ;;  %v2887_v26 = vsel %vm436_vm5, 1.0, %v4950_v49  ;;  %vm482_vm6 = vcmp.eq.s32.totalorder %v4136_v24, %v4174_v52  ;;  %vm483_vm7 = vcmp.eq.s32.totalorder %v4141_v31, %v4174_v52 }
  0x5d   : > { %v468_v27 = vmul.f32 %v2886_v25, %v4152_v40  ;;  %v621_v28 = vadd.f32 %v613_v17, %v571_v21  ;;  %v622_v29 = vadd.f32 %v614_v19, %v572_v23  ;;  %v469_v43 = vmul.f32 %v2887_v26, %v4152_v40 }
  0x5e   : > { %v2894_v30 = vsel %vm482_vm6, 1.0, %v4950_v49  ;;  %v2895_v33 = vsel %vm483_vm7, 1.0, %v4950_v49  ;;  %vm536_vm8 = vcmp.eq.s32.totalorder %v4136_v24, %v4176_v53  ;;  %vm537_vm9 = vcmp.eq.s32.totalorder %v4141_v31, %v4176_v53 }
  0x5f   : > { %v514_v34 = vmul.f32 %v2894_v30, %v4154_v41  ;;  %v3648_v35 = vpack.c.bf16 %v622_v29, %v621_v28  ;;  %v515_v36 = vmul.f32 %v2895_v33, %v4154_v41  ;;  %v2902_v52 = vsel %vm536_vm8, 1.0, %v4950_v49 }
  0x60   : > { %v2903_v37 = vsel %vm537_vm9, 1.0, %v4950_v49  ;;  %v565_v38 = vmul.f32 %v2902_v52, %v4161_v47  ;;  %vm586_vm10 = vcmp.eq.s32.totalorder %v4136_v24, %v4180_v56  ;;  %vm587_vm11 = vcmp.eq.s32.totalorder %v4141_v31, %v4180_v56 }
  0x61   : > { %v522_v40 = vadd.f32 %v514_v34, %v468_v27  ;;  %v566_v44 = vmul.f32 %v2903_v37, %v4161_v47  ;;  %3649 = vmatprep.subr.bf16.mxu0 %v3648_v35  ;;  %v523_v45 = vadd.f32 %v515_v36, %v469_v43  ;;  %v2910_v53 = vsel %vm586_vm10, 1.0, %v4950_v49 }
  0x62   : > { %v766_v41 = vmul.f32 %v4166_v50, %v765_v42  ;;  %3651 = vmatpush3.bf16.msra.mxu0 %v3648_v35  ;;  %v2911_v54 = vsel %vm587_vm11, 1.0, %v4950_v49  ;;  %v615_v47 = vmul.f32 %v2910_v53, %v4163_v48  ;;  %v2921_v24 = vsel %vm4268_vm15, 1.0, %v4950_v49 }
  0x63   : > { %v573_v46 = vadd.f32 %v565_v38, %v522_v40  ;;  %v574_v18 = vadd.f32 %v566_v44, %v523_v45  ;;  %v616_v31 = vmul.f32 %v2911_v54, %v4163_v48  ;;  %v778_v12 = vmul.f32 %v2921_v24, %v777_v39  ;;  %v385_v39 = vld [vmem:[%s4945_s4 + $0x18] sm:$0xff]  ;;  %v392_v48 = vld [vmem:[%s4102_s24 + $0x10] sm:$0xff]  ;;  %s2978_s24 = sld [smem:[#allocation2 + $0x100]]  ;;  %v4388_v24 = vld [vmem:[%s4943_s2] sm:$0xff] }
  0x64   : > { %v1012_v4 = vstv %s2931_s19  ;;  %v1009_v6 = vstv %s1008_s21  ;;  %v1019_v7 = vstv %s2932_s22  ;;  %v4952_v26 = vmov 0.0|0.0   ;;  %s2935_s19 = sld [smem:[#allocation2 + $0x82]]  ;;  %s2982_s21 = sld [smem:[#allocation2 + $0x181]] }
  0x65   : > { %v623_v42 = vadd.f32 %v615_v47, %v573_v46  ;;  %v624_v50 = vadd.f32 %v616_v31, %v574_v18  ;;  %v779_v56 = vadd.f32 %v778_v12, %v766_v41  ;;  %v1013_v5 = vmul.f32 %v1012_v4, %v4097_v1  ;;  %v4395_v31 = vld [vmem:[%s4943_s2 + $0x8] sm:$0xff]  ;;  %s2981_s22 = sld [smem:[#allocation2 + $0x180]] }
  0x66   : > { %v1010_v10 = vmul.f32 %v1009_v6, %v4097_v1  ;;  %v1020_v14 = vmul.f32 %v1019_v7, %v4097_v1  ;;  %vm3956_vm15 = vmmov 0   ;;  %vm1108_vm2 = vcmask 130048  }
  0x67   : > { %v3652_v57 = vpack.c.bf16 %v624_v50, %v623_v42  ;;  %3334 = vmatprep.subr.mxu1 %v779_v56  ;;  %v1015_v11 = vrot.slane %v1013_v5, 1  ;;  %v1551_v18 = vstv %s2979_s23  ;;  %v1558_v50 = vstv %s2980_s25  ;;  %v4454_v5 = vld [vmem:[%s4943_s2 + $0x48] sm:$0xff]  ;;  %s3767_s23 = smul.u32 384, %s4087_s12  ;;  %s3047_s25 = sld [smem:[#allocation2 + $0x282]] }
  0x68   : > { %3335 = vmatpush3.msra.mxu1 %v779_v56  ;;  %v1022_v32 = vrot.slane %v1020_v14, 2  ;;  %v1552_v42 = vmul.f32 %v1551_v18, %v4097_v1  ;;  %v4468_v14 = vld [vmem:[%s4943_s2 + $0x58] sm:$0xff] }
  0x69   : > { %3653 = vmatprep.subr.bf16.mxu0 %v3652_v57  ;;  %3337 = vmatmul.mubr.msk.f32.vlgmr.msra.gmra.mrb[0].mxu1 %vm780_vm0, %v383_v55  ;;  %v1017_v15 = vadd.f32 %v1015_v11, %v1010_v10  ;;  %v1548_v47 = vstv %s2978_s24  ;;  %v1559_v55 = vmul.f32 %v1558_v50, %v4097_v1  ;;  %v4459_v10 = vld [vmem:[%s4943_s2 + $0x50] sm:$0xff]  ;;  %4967 = vst [vmem:[#allocation9_spill] sm:$0xff] %v4468_v14  ;;  %s2983_s24 = sld [smem:[#allocation2 + $0x182]]  ;;  %s4584_s11 = scalar_lea.vmem %s4947_s6, %s3767_s23 }
  0x6a   : > { %3655 = vmatpush3.bf16.msra.mxu0 %v3652_v57  ;;  %3339 = vmatprep.mubr.msk.f32.mxu1 %vm780_vm0, %v384_v58  ;;  %v1549_v12 = vmul.f32 %v1548_v47, %v4097_v1  ;;  %v1554_v56 = vrot.slane %v1552_v42, 1  ;;  %v4405_v57 = vld [vmem:[%s4943_s2 + $0x10] sm:$0xff]  ;;  %4966 = vst [vmem:[#allocation8_spill] sm:$0xff] %v4459_v10  ;;  %s3045_s23 = sld [smem:[#allocation2 + $0x280]] }
  0x6b   : > { %v1024_v51 = vadd.f32 %v1022_v32, %v1017_v15  ;;  %3656 = vmatprep.subr.bf16.mxu1 %v4952_v26 }
  0x6c   : > { %v1556_v58 = vadd.f32 %v1554_v56, %v1549_v12  ;;  %v1565_v12 = vstv %s2981_s22  ;;  %s3046_s22 = sld [smem:[#allocation2 + $0x281]] }
  0x6d   : > { %3323 = vmatmul.mubr.msk.f32.vlgmr.msra.gmra.mrb[0].mxu0 %vm625_vm1, %v391_v9  ;;  %3340 = vmatmul.mubr.msk.f32.gmra.mrb[2].mxu1 %vm780_vm0, %v385_v39  ;;  %v1042_v16 = vadd.f32 1.0, %v1024_v51  ;;  %v1561_v9 = vrot.slane %v1559_v55, 2  ;;  %v4412_v39 = vld [vmem:[%s4943_s2 + $0x18] sm:$0xff]  ;;  %v4474_v51 = vld [vmem:[%s4943_s2 + $0x60] sm:$0xff]  ;;  %v1566_v55 = vmul.f32 %v1565_v12, %v4097_v1 }
  0x6e   : > { %3325 = vmatprep.mubr.msk.f32.mxu0 %vm625_vm1, %v392_v48  ;;  %3342 = vmatprep.mubr.msk.f32.mxu1 %vm780_vm0, %v386_v20  ;;  %v4417_v20 = vld [vmem:[%s4943_s2 + $0x20] sm:$0xff]  ;;  %4968 = vst [vmem:[#allocation10_spill] sm:$0xff] %v4474_v51 }
  0x6f   : > { %v1043_v17 = vmul.f32 16.0, %v1042_v16  ;;  %v1563_v48 = vadd.f32 %v1561_v9, %v1556_v58  ;;  %v4485_v16 = vld [vmem:[%s4943_s2 + $0x68] sm:$0xff]  ;;  %v1575_v42 = vstv %s2983_s24  ;;  %s360_s24 = sand.u32 1, %s3935_s28  }
  0x70   : > { %4969 = vst [vmem:[#allocation11_spill] sm:$0xff] %v4485_v16  ;;  %v1576_v9 = vmul.f32 %v1575_v42, %v4097_v1  ;;  %s2875_s26 = sshll.u32 %s360_s24, 4 }
  0x71   : > { %3326 = vmatmul.mubr.msk.f32.gmra.mrb[2].mxu0 %vm625_vm1, %v393_v59  ;;  %3343 = vmatmul.mubr.msk.f32.gmra.mrb[4].mxu1 %vm780_vm0, %v387_v60  ;;  %v2936_v21 = vadd.f32 -1.0, %v1043_v17  ;;  %v1581_v59 = vadd.f32 1.0, %v1563_v48  ;;  %v4426_v60 = vld [vmem:[%s4943_s2 + $0x28] sm:$0xff] }
  0x72   : > { %3328 = vmatprep.mubr.msk.f32.mxu0 %vm625_vm1, %v394_v61  ;;  %3345 = vmatprep.mubr.msk.f32.mxu1 %vm780_vm0, %v388_v62  ;;  %v4431_v62 = vld [vmem:[%s4943_s2 + $0x30] sm:$0xff] }
  0x73   : > { %v1045_v23 = vmul.f32 0.5, %v2936_v21  ;;  %v1582_v61 = vmul.f32 16.0, %v1581_v59 }
  0x75   : > { %3329 = vmatmul.mubr.msk.f32.gmra.mrb[4].mxu0 %vm625_vm1, %v395_v63  ;;  %3346 = vmatmul.mubr.msk.f32.gmra.mrb[6].mxu1 %vm780_vm0, %v389_v0  ;;  %v1050_v19 = vfloor.f32 %v1045_v23  ;;  %v2984_v63 = vadd.f32 -1.0, %v1582_v61  ;;  %v4440_v0 = vld [vmem:[%s4943_s2 + $0x38] sm:$0xff]  ;;  %v1578_v61 = vrot.slane %v1576_v9, 2 }
  0x76   : > { %3331 = vmatprep.mubr.msk.f32.mxu0 %vm625_vm1, %v396_v2  ;;  %3364 = vmatprep.mubr.msk.f32.mxu1 %vm3956_vm15, %v4950_v49 }
  0x77   : > { %v3770_v25 = vtrunc.f32 %v1050_v19  ;;  %v1052_v28 = vsub.f32 %v1045_v23, %v1050_v19  ;;  %v1584_v2 = vmul.f32 0.5, %v2984_v63  ;;  %v4491_v23 = vld [vmem:[%s4943_s2 + $0x70] sm:$0xff] }
  0x78   : > { %4970 = vst [vmem:[#allocation12_spill] sm:$0xff] %v4491_v23 }
  0x79   : > { %3332 = vmatmul.mubr.msk.f32.gmra.mrb[6].mxu0 %vm625_vm1, %v397_v3  ;;  %v3771_v27 = vcvt.f32.s32 %v3770_v25  ;;  %v1312_v30 = vsub.f32 1.0, %v1052_v28  ;;  %v1333_v44 = vrot.slane %v1052_v28, %v4130_v22  ;;  %v4445_v3 = vld [vmem:[%s4943_s2 + $0x40] sm:$0xff]  ;;  %v1589_v4 = vfloor.f32 %v1584_v2 }
  0x7a   : > { %3399 = vmatprep.mubr.msk.f32.mxu0 %vm1108_vm2, %v4388_v24 }
  0x7b   : > { %v1319_v29 = vadd.s32 1, %v3771_v27  ;;  %v1305_v43 = vrot.slane %v3771_v27, %v4130_v22  ;;  %v1316_v34 = vrot.slane %v1312_v30, %v4130_v22  ;;  %v1591_v6 = vsub.f32 %v1584_v2, %v1589_v4 }
  0x7c   : > { %v3774_v7 = vtrunc.f32 %v1589_v4 }
  0x7d   : > { %v1323_v33 = vrot.slane %v1319_v29, %v4130_v22  ;;  %vm1306_vm0 = vcmp.eq.s32.totalorder %v4107_v8, %v1305_v43  ;;  %vm1307_vm12 = vcmp.eq.s32.totalorder %v4115_v13, %v1305_v43  ;;  %v1851_v32 = vsub.f32 1.0, %v1591_v6  ;;  %v4504_v29 = vld [vmem:[%s4943_s2 + $0x78] sm:$0xff] }
  0x7e   : > { %v2958_v35 = vsel %vm1306_vm0, 1.0, %v4950_v49  ;;  %v2959_v36 = vsel %vm1307_vm12, 1.0, %v4950_v49  ;;  %v3775_v11 = vcvt.f32.s32 %v3774_v7  ;;  %v1872_v28 = vrot.slane %v1591_v6, %v4130_v22  ;;  %4971 = vst [vmem:[#allocation13_spill] sm:$0xff] %v4504_v29 }
  0x7f   : > { %vm1324_vm13 = vcmp.eq.s32.totalorder %v4107_v8, %v1323_v33  ;;  %vm1325_vm14 = vcmp.eq.s32.totalorder %v4115_v13, %v1323_v33  ;;  %v1317_v37 = vmul.f32 %v2958_v35, %v1316_v34  ;;  %v1318_v40 = vmul.f32 %v2959_v36, %v1316_v34 }
  0x80   : > { %v2960_v52 = vsel %vm1324_vm13, 1.0, %v4950_v49  ;;  %v2961_v38 = vsel %vm1325_vm14, 1.0, %v4950_v49  ;;  %v1844_v15 = vrot.slane %v3775_v11, %v4130_v22  ;;  %v1855_v17 = vrot.slane %v1851_v32, %v4130_v22 }
  0x81   : > { %v1334_v45 = vmul.f32 %v2960_v52, %v1333_v44  ;;  %v1335_v53 = vmul.f32 %v2961_v38, %v1333_v44  ;;  %v1858_v21 = vadd.s32 1, %v3775_v11  ;;  %v1029_v38 = vstv %s2934_s14 }
  0x82   : > { %vm1845_vm3 = vcmp.eq.s32.totalorder %v4107_v8, %v1844_v15  ;;  %vm1846_vm4 = vcmp.eq.s32.totalorder %v4115_v13, %v1844_v15  ;;  %v1030_v44 = vmul.f32 %v1029_v38, %v4097_v1 }
  0x83   : > { %v1336_v41 = vadd.f32 %v1334_v45, %v1317_v37  ;;  %v1337_v46 = vadd.f32 %v1335_v53, %v1318_v40  ;;  %v3022_v19 = vsel %vm1845_vm3, 1.0, %v4950_v49  ;;  %v3023_v25 = vsel %vm1846_vm4, 1.0, %v4950_v49 }
  0x84   : > { %v1862_v27 = vrot.slane %v1858_v21, %v4130_v22  ;;  %v1856_v43 = vmul.f32 %v3022_v19, %v1855_v17  ;;  %v1857_v30 = vmul.f32 %v3023_v25, %v1855_v17  ;;  %v1026_v45 = vstv %s2933_s16  ;;  %s3043_s16 = sld [smem:[#allocation2 + $0x201]] }
  0x85   : > { %v3672_v54 = vpack.c.bf16 %v1337_v46, %v1336_v41  ;;  %v1036_v53 = vstv %s2935_s19  ;;  %v1568_v41 = vstv %s2982_s21  ;;  %v1027_v46 = vmul.f32 %v1026_v45, %v4097_v1  ;;  %s3042_s19 = sld [smem:[#allocation2 + $0x200]]  ;;  %s3044_s21 = sld [smem:[#allocation2 + $0x202]] }
  0x86   : > { %vm1863_vm5 = vcmp.eq.s32.totalorder %v4107_v8, %v1862_v27  ;;  %vm1864_vm6 = vcmp.eq.s32.totalorder %v4115_v13, %v1862_v27  ;;  %v1037_v47 = vmul.f32 %v1036_v53, %v4097_v1  ;;  %v1569_v18 = vmul.f32 %v1568_v41, %v4097_v1 }
  0x87   : > { %3673 = vmatprep.subr.bf16.mxu0 %v3672_v54  ;;  %v3024_v33 = vsel %vm1863_vm5, 1.0, %v4950_v49  ;;  %v3025_v34 = vsel %vm1864_vm6, 1.0, %v4950_v49 }
  0x88   : > { %3675 = vmatpush3.bf16.msra.mxu0 %v3672_v54  ;;  %v1873_v35 = vmul.f32 %v3024_v33, %v1872_v28  ;;  %v1874_v36 = vmul.f32 %v3025_v34, %v1872_v28  ;;  %v1032_v54 = vrot.slane %v1030_v44, 1  ;;  %v1039_v56 = vrot.slane %v1037_v47, 2 }
  0x89   : > { %v1571_v58 = vrot.slane %v1569_v18, 1 }
  0x8a   : > { %v1875_v52 = vadd.f32 %v1873_v35, %v1856_v43  ;;  %v1876_v37 = vadd.f32 %v1874_v36, %v1857_v30  ;;  %v1034_v50 = vadd.f32 %v1032_v54, %v1027_v46 }
  0x8b   : > { %3400 = vmatmul.mubr.msk.f32.vlgmr.msra.gmra.mrb[8].mxu0 %vm1108_vm2, %v4395_v31  ;;  %v1573_v59 = vadd.f32 %v1571_v58, %v1566_v55 }
  0x8c   : > { %3402 = vmatprep.mubr.msk.f32.mxu0 %vm1108_vm2, %v4405_v57  ;;  %v3680_v40 = vpack.c.bf16 %v1876_v37, %v1875_v52  ;;  %v1041_v48 = vadd.f32 %v1039_v56, %v1034_v50 }
  0x8d   : > { %v1580_v2 = vadd.f32 %v1578_v61, %v1573_v59 }
  0x8e   : > { %3681 = vmatprep.subr.bf16.mxu0 %v3680_v40  ;;  %v1046_v63 = vadd.f32 1.0, %v1041_v48 }
  0x8f   : > { %3403 = vmatmul.mubr.msk.f32.gmra.mrb[10].mxu0 %vm1108_vm2, %v4412_v39  ;;  %v1585_v4 = vadd.f32 1.0, %v1580_v2 }
  0x90   : > { %3405 = vmatprep.mubr.msk.f32.mxu0 %vm1108_vm2, %v4417_v20  ;;  %3683 = vmatpush3.bf16.msra.mxu0 %v3680_v40  ;;  %v1047_v1 = vmul.f32 16.0, %v1046_v63 }
  0x91   : > { %3684 = vmatprep.subr.bf16.mxu0 %v4952_v26  ;;  %v1586_v7 = vmul.f32 16.0, %v1585_v4 }
  0x92   : > { %v2937_v6 = vadd.f32 -1.0, %v1047_v1 }
  0x93   : > { %3406 = vmatmul.mubr.msk.f32.gmra.mrb[12].mxu0 %vm1108_vm2, %v4426_v60  ;;  %v2985_v15 = vadd.f32 -1.0, %v1586_v7 }
  0x94   : > { %3408 = vmatprep.mubr.msk.f32.mxu0 %vm1108_vm2, %v4431_v62  ;;  %v1049_v11 = vmul.f32 0.5, %v2937_v6 }
  0x95   : > { %v1588_v17 = vmul.f32 0.5, %v2985_v15 }
  0x96   : > { %v1051_v32 = vfloor.f32 %v1049_v11 }
  0x97   : > { %3409 = vmatmul.mubr.msk.f32.gmra.mrb[14].mxu0 %vm1108_vm2, %v4440_v0  ;;  %v1590_v19 = vfloor.f32 %v1588_v17 }
  0x98   : > { %3411 = vmatprep.mubr.msk.f32.mxu0 %vm1108_vm2, %v4445_v3  ;;  %v3772_v21 = vtrunc.f32 %v1051_v32  ;;  %v1053_v28 = vsub.f32 %v1049_v11, %v1051_v32 }
  0x99   : > { %v3776_v27 = vtrunc.f32 %v1590_v19  ;;  %v1592_v40 = vsub.f32 %v1588_v17, %v1590_v19 }
  0x9a   : > { %v3773_v25 = vcvt.f32.s32 %v3772_v21  ;;  %v1066_v35 = vsub.f32 1.0, %v1053_v28  ;;  %v1087_v42 = vrot.slane %v1053_v28, %v4130_v22 }
  0x9b   : > { %3412 = vmatmul.mubr.msk.f32.gmra.mrb[16].mxu0 %vm1108_vm2, %v4454_v5  ;;  %v3777_v30 = vcvt.f32.s32 %v3776_v27  ;;  %v1605_v58 = vsub.f32 1.0, %v1592_v40  ;;  %v1626_v17 = vrot.slane %v1592_v40, %v4130_v22 }
  0x9c   : > { %3414 = vmatprep.mubr.msk.f32.mxu0 %vm1108_vm2, %v4459_v10  ;;  %v1073_v43 = vadd.s32 1, %v3773_v25  ;;  %v1059_v33 = vrot.slane %v3773_v25, %v4130_v22  ;;  %v1070_v45 = vrot.slane %v1066_v35, %v4130_v22 }
  0x9d   : > { %v1612_v37 = vadd.s32 1, %v3777_v30  ;;  %v1598_v53 = vrot.slane %v3777_v30, %v4130_v22  ;;  %v1609_v32 = vrot.slane %v1605_v58, %v4130_v22  ;;  %v1093_v58 = vld [vmem:[%s4584_s11 + $0x8] sm:$0xff] }
  0x9e   : > { %v1077_v36 = vrot.slane %v1073_v43, %v4130_v22  ;;  %vm1060_vm7 = vcmp.eq.s32.totalorder %v4107_v8, %v1059_v33  ;;  %vm1061_vm8 = vcmp.eq.s32.totalorder %v4115_v13, %v1059_v33 }
  0x9f   : > { %3415 = vmatmul.mubr.msk.f32.gmra.mrb[18].mxu0 %vm1108_vm2, %v4468_v14  ;;  %v2938_v47 = vsel %vm1060_vm7, 1.0, %v4950_v49  ;;  %v1616_v18 = vrot.slane %v1612_v37, %v4130_v22  ;;  %v2939_v50 = vsel %vm1061_vm8, 1.0, %v4950_v49  ;;  %vm1599_vm11 = vcmp.eq.s32.totalorder %v4107_v8, %v1598_v53 }
  0xa0   : > { %3417 = vmatprep.mubr.msk.f32.mxu0 %vm1108_vm2, %v4474_v51  ;;  %vm1078_vm9 = vcmp.eq.s32.totalorder %v4107_v8, %v1077_v36  ;;  %vm1079_vm10 = vcmp.eq.s32.totalorder %v4115_v13, %v1077_v36  ;;  %v1071_v61 = vmul.f32 %v2938_v47, %v1070_v45  ;;  %vm1600_vm0 = vcmp.eq.s32.totalorder %v4115_v13, %v1598_v53 }
  0xa1   : > { %v2940_v56 = vsel %vm1078_vm9, 1.0, %v4950_v49  ;;  %v2941_v55 = vsel %vm1079_vm10, 1.0, %v4950_v49  ;;  %vm1617_vm12 = vcmp.eq.s32.totalorder %v4107_v8, %v1616_v18  ;;  %vm1618_vm13 = vcmp.eq.s32.totalorder %v4115_v13, %v1616_v18 }
  0xa2   : > { %v1072_v6 = vmul.f32 %v2939_v50, %v1070_v45  ;;  %v1088_v7 = vmul.f32 %v2940_v56, %v1087_v42  ;;  %v1089_v11 = vmul.f32 %v2941_v55, %v1087_v42  ;;  %v2986_v15 = vsel %vm1599_vm11, 1.0, %v4950_v49  ;;  %v381_v50 = vld [vmem:[%s4944_s3] sm:$0xff] }
  0xa3   : > { %3418 = vmatmul.mubr.msk.f32.gmra.mrb[20].mxu0 %vm1108_vm2, %v4485_v16  ;;  %v2987_v27 = vsel %vm1600_vm0, 1.0, %v4950_v49  ;;  %v2988_v28 = vsel %vm1617_vm12, 1.0, %v4950_v49  ;;  %v2989_v43 = vsel %vm1618_vm13, 1.0, %v4950_v49  ;;  %v1610_v37 = vmul.f32 %v2986_v15, %v1609_v32  ;;  %v1092_v56 = vld [vmem:[%s4584_s11] sm:$0xff]  ;;  %v1105_v15 = vld [vmem:[%s4584_s11 + $0x68] sm:$0xff] }
  0xa4   : > { %3420 = vmatprep.mubr.msk.f32.mxu0 %vm1108_vm2, %v4491_v23  ;;  %v1090_v36 = vadd.f32 %v1088_v7, %v1071_v61  ;;  %v1611_v40 = vmul.f32 %v2987_v27, %v1609_v32  ;;  %v1097_v61 = vld [vmem:[%s4584_s11 + $0x28] sm:$0xff]  ;;  %v1103_v7 = vld [vmem:[%s4584_s11 + $0x58] sm:$0xff]  ;;  %v1106_v32 = vld [vmem:[%s4584_s11 + $0x70] sm:$0xff] }
  0xa5   : > { %v2993_v27 = vld [vmem:[%s4584_s11 + $0x98] sm:$0xff] }
  0xa7   : > { %3421 = vmatmul.mubr.msk.f32.gmra.mrb[22].mxu0 %vm1108_vm2, %v4504_v29 }
  0xa8   : > { %3455 = vmatprep.mubr.msk.f32.mxu0 %vm1108_vm2, %v4388_v24 }
  0xab   : > { %3456 = vmatmul.mubr.msk.f32.vlgmr.msra.gmra.mrb[24].mxu0 %vm1108_vm2, %v4395_v31 }
  0xac   : > { %3458 = vmatprep.mubr.msk.f32.mxu0 %vm1108_vm2, %v4405_v57 }
  0xaf   : > { %3459 = vmatmul.mubr.msk.f32.gmra.mrb[26].mxu0 %vm1108_vm2, %v4412_v39 }
  0xb0   : > { %3461 = vmatprep.mubr.msk.f32.mxu0 %vm1108_vm2, %v4417_v20 }
  0xb3   : > { %3462 = vmatmul.mubr.msk.f32.gmra.mrb[28].mxu0 %vm1108_vm2, %v4426_v60 }
  0xb4   : > { %3464 = vmatprep.mubr.msk.f32.mxu0 %vm1108_vm2, %v4431_v62 }
  0xb7   : > { %3465 = vmatmul.mubr.msk.f32.gmra.mrb[30].mxu0 %vm1108_vm2, %v4440_v0 }
  0xb8   : > { %3467 = vmatprep.mubr.msk.f32.mxu0 %vm1108_vm2, %v4445_v3 }
  0xbb   : > { %3468 = vmatmul.mubr.msk.f32.gmra.mrb[32].mxu0 %vm1108_vm2, %v4454_v5 }
  0xbc   : > { %3470 = vmatprep.mubr.msk.f32.mxu0 %vm1108_vm2, %v4459_v10 }
  0xbf   : > { %3471 = vmatmul.mubr.msk.f32.gmra.mrb[34].mxu0 %vm1108_vm2, %v4468_v14 }
  0xc0   : > { %3473 = vmatprep.mubr.msk.f32.mxu0 %vm1108_vm2, %v4474_v51 }
  0xc3   : > { %3474 = vmatmul.mubr.msk.f32.gmra.mrb[36].mxu0 %vm1108_vm2, %v4485_v16 }
  0xc4   : > { %3476 = vmatprep.mubr.msk.f32.mxu0 %vm1108_vm2, %v4491_v23 }
  0xc7   : > { %3477 = vmatmul.mubr.msk.f32.gmra.mrb[38].mxu0 %vm1108_vm2, %v4504_v29 }
  0xc8   : > { %3511 = vmatprep.mubr.msk.f32.mxu0 %vm3956_vm15, %v4950_v49 }
 0x13c   : > { %v3338_v34 = vpop.f32.mrb[0].mxu1 }
 0x13d   : > { %v871_v52 = vpop.f32.mrb[1].mxu1 }
 0x140   : > { %v3324_v38 = vpop.f32.mrb[0].mxu0  ;;  %v3341_v44 = vpop.f32.mrb[2].mxu1 }
 0x141   : > { %v911_v41 = vmul.f32 %v3338_v34, %v3324_v38  ;;  %v716_v46 = vpop.f32.mrb[1].mxu0  ;;  %v881_v54 = vpop.f32.mrb[3].mxu1  ;;  %v1627_v38 = vmul.f32 %v2988_v28, %v1626_v17  ;;  %v2994_v28 = vld [vmem:[%s4584_s11 + $0xa0] sm:$0xff] }
 0x142   : > { %v910_v12 = vmul.f32 %v871_v52, %v716_v46  ;;  %v1091_v52 = vadd.f32 %v1089_v11, %v1072_v6  ;;  %v1102_v6 = vld [vmem:[%s4584_s11 + $0x50] sm:$0xff]  ;;  %v1104_v11 = vld [vmem:[%s4584_s11 + $0x60] sm:$0xff] }
 0x143   : > { %v1629_v18 = vadd.f32 %v1627_v38, %v1610_v37  ;;  %v3002_v37 = vld [vmem:[%s4584_s11 + $0xe0] sm:$0xff]  ;;  %v3004_v38 = vld [vmem:[%s4584_s11 + $0xf0] sm:$0xff] }
 0x144   : > { %v3657_v9 = vpack.c.bf16 %v911_v41, %v910_v12  ;;  %v3327_v48 = vpop.f32.mrb[2].mxu0  ;;  %v3344_v59 = vpop.f32.mrb[4].mxu1  ;;  %v3668_v47 = vpack.c.bf16 %v1091_v52, %v1090_v36  ;;  %v3000_v36 = vld [vmem:[%s4584_s11 + $0xd0] sm:$0xff]  ;;  %v3001_v52 = vld [vmem:[%s4584_s11 + $0xd8] sm:$0xff] }
 0x145   : > { %v913_v63 = vmul.f32 %v3341_v44, %v3327_v48  ;;  %v726_v2 = vpop.f32.mrb[3].mxu0  ;;  %v891_v1 = vpop.f32.mrb[5].mxu1  ;;  %v1628_v44 = vmul.f32 %v2989_v43, %v1626_v17  ;;  %v1095_v48 = vld [vmem:[%s4584_s11 + $0x18] sm:$0xff]  ;;  %v2995_v43 = vld [vmem:[%s4584_s11 + $0xa8] sm:$0xff] }
 0x146   : > { %v912_v4 = vmul.f32 %v881_v54, %v726_v2  ;;  %3658 = vmatpush3.bf16.msra.mxu1 %v3657_v9  ;;  %v1094_v9 = vld [vmem:[%s4584_s11 + $0x10] sm:$0xff]  ;;  %v1099_v2 = vld [vmem:[%s4584_s11 + $0x38] sm:$0xff] }
 0x147   : > { %3659 = vmatprep.subr.bf16.mxu1 %v4952_v26  ;;  %v1630_v12 = vadd.f32 %v1628_v44, %v1611_v40  ;;  %v1107_v17 = vld [vmem:[%s4584_s11 + $0x78] sm:$0xff]  ;;  %v3003_v40 = vld [vmem:[%s4584_s11 + $0xe8] sm:$0xff] }
 0x148   : > { %v3660_v21 = vpack.c.bf16 %v913_v63, %v912_v4  ;;  %v3330_v19 = vpop.f32.mrb[4].mxu0  ;;  %v3347_v25 = vpop.f32.mrb[6].mxu1  ;;  %v1098_v63 = vld [vmem:[%s4584_s11 + $0x30] sm:$0xff]  ;;  %v1101_v4 = vld [vmem:[%s4584_s11 + $0x48] sm:$0xff]  ;;  %v3005_v44 = vld [vmem:[%s4584_s11 + $0xf8] sm:$0xff] }
 0x149   : > { %v915_v30 = vmul.f32 %v3344_v59, %v3330_v19  ;;  %v736_v33 = vpop.f32.mrb[5].mxu0  ;;  %v901_v34 = vpop.f32.mrb[7].mxu1  ;;  %v3676_v55 = vpack.c.bf16 %v1630_v12, %v1629_v18  ;;  %v1096_v59 = vld [vmem:[%s4584_s11 + $0x20] sm:$0xff]  ;;  %v2991_v19 = vld [vmem:[%s4584_s11 + $0x88] sm:$0xff] }
 0x14a   : > { %v914_v35 = vmul.f32 %v891_v1, %v736_v33  ;;  %3661 = vmatpush3.bf16.msra.mxu1 %v3660_v21  ;;  %v1100_v1 = vld [vmem:[%s4584_s11 + $0x40] sm:$0xff]  ;;  %v2997_v33 = vld [vmem:[%s4584_s11 + $0xb8] sm:$0xff] }
 0x14b   : > { %3662 = vmatprep.subr.bf16.mxu1 %v4952_v26  ;;  %v2990_v21 = vld [vmem:[%s4584_s11 + $0x80] sm:$0xff] }
 0x14c   : > { %v3663_v45 = vpack.c.bf16 %v915_v30, %v914_v35  ;;  %v3333_v53 = vpop.f32.mrb[6].mxu0  ;;  %v2996_v30 = vld [vmem:[%s4584_s11 + $0xb0] sm:$0xff]  ;;  %v2999_v35 = vld [vmem:[%s4584_s11 + $0xc8] sm:$0xff] }
 0x14d   : > { %v917_v41 = vmul.f32 %v3347_v25, %v3333_v53  ;;  %v746_v46 = vpop.f32.mrb[7].mxu0  ;;  %v2992_v25 = vld [vmem:[%s4584_s11 + $0x90] sm:$0xff] }
 0x14e   : > { %v916_v54 = vmul.f32 %v901_v34, %v746_v46  ;;  %3664 = vmatpush3.bf16.msra.mxu1 %v3663_v45  ;;  %v2998_v34 = vld [vmem:[%s4584_s11 + $0xc0] sm:$0xff] }
 0x14f   : > { %3665 = vmatprep.subr.bf16.mxu1 %v4952_v26 }
 0x150   : > { %v3666_v42 = vpack.c.bf16 %v917_v41, %v916_v54 }
 0x152   : > { %3667 = vmatpush3.bf16.msra.mxu1 %v3666_v42 }
 0x153   : > { %3669 = vmatprep.subr.bf16.mxu1 %v3668_v47 }
 0x155   : > { %3365 = vmatmul.mubr.msk.f32.vlgmr.msra.gmra.mrb[8].mxu1 %vm625_vm1, %v381_v50 }
 0x156   : > { %3671 = vmatpush3.bf16.msra.mxu1 %v3668_v47  ;;  %3371 = vmatprep.mubr.msk.f32.mxu1 %vm1108_vm2, %v1092_v56 }
 0x157   : > { %3677 = vmatprep.subr.bf16.mxu1 %v3676_v55 }
 0x159   : > { %3372 = vmatmul.mubr.msk.f32.vlgmr.msra.gmra.mrb[10].mxu1 %vm1108_vm2, %v1093_v58 }
 0x15a   : > { %3679 = vmatpush3.bf16.msra.mxu1 %v3676_v55  ;;  %3374 = vmatprep.mubr.msk.f32.mxu1 %vm1108_vm2, %v1094_v9 }
 0x15b   : > { %3708 = vmatprep.subr.bf16.mxu1 %v4952_v26 }
 0x15d   : > { %3375 = vmatmul.mubr.msk.f32.gmra.mrb[12].mxu1 %vm1108_vm2, %v1095_v48 }
 0x15e   : > { %3377 = vmatprep.mubr.msk.f32.mxu1 %vm1108_vm2, %v1096_v59  ;;  %v4657_v45 = vpop.f32.mrb[8].mxu0 }
 0x15f   : > { %v4659_v53 = vpop.f32.mrb[9].mxu0 }
 0x161   : > { %3378 = vmatmul.mubr.msk.f32.gmra.mrb[14].mxu1 %vm1108_vm2, %v1097_v61 }
 0x162   : > { %3380 = vmatprep.mubr.msk.f32.mxu1 %vm1108_vm2, %v1098_v63  ;;  %v4661_v41 = vpop.f32.mrb[10].mxu0 }
 0x163   : > { %v4663_v46 = vpop.f32.mrb[11].mxu0 }
 0x165   : > { %3381 = vmatmul.mubr.msk.f32.gmra.mrb[16].mxu1 %vm1108_vm2, %v1099_v2 }
 0x166   : > { %3383 = vmatprep.mubr.msk.f32.mxu1 %vm1108_vm2, %v1100_v1  ;;  %v4665_v54 = vpop.f32.mrb[12].mxu0 }
 0x167   : > { %v4667_v47 = vpop.f32.mrb[13].mxu0 }
 0x169   : > { %3384 = vmatmul.mubr.msk.f32.gmra.mrb[18].mxu1 %vm1108_vm2, %v1101_v4 }
 0x16a   : > { %3386 = vmatprep.mubr.msk.f32.mxu1 %vm1108_vm2, %v1102_v6  ;;  %v4669_v18 = vpop.f32.mrb[14].mxu0 }
 0x16b   : > { %v4671_v12 = vpop.f32.mrb[15].mxu0 }
 0x16d   : > { %3387 = vmatmul.mubr.msk.f32.gmra.mrb[20].mxu1 %vm1108_vm2, %v1103_v7 }
 0x16e   : > { %3389 = vmatprep.mubr.msk.f32.mxu1 %vm1108_vm2, %v1104_v11  ;;  %v4673_v42 = vpop.f32.mrb[16].mxu0 }
 0x16f   : > { %v4675_v50 = vpop.f32.mrb[17].mxu0 }
 0x171   : > { %3390 = vmatmul.mubr.msk.f32.gmra.mrb[22].mxu1 %vm1108_vm2, %v1105_v15 }
 0x172   : > { %3392 = vmatprep.mubr.msk.f32.mxu1 %vm1108_vm2, %v1106_v32  ;;  %v4677_v56 = vpop.f32.mrb[18].mxu0 }
 0x173   : > { %v4679_v55 = vpop.f32.mrb[19].mxu0 }
 0x175   : > { %3393 = vmatmul.mubr.msk.f32.gmra.mrb[24].mxu1 %vm1108_vm2, %v1107_v17 }
 0x176   : > { %3427 = vmatprep.mubr.msk.f32.mxu1 %vm1108_vm2, %v2990_v21  ;;  %v4681_v58 = vpop.f32.mrb[20].mxu0 }
 0x177   : > { %v4683_v9 = vpop.f32.mrb[21].mxu0 }
 0x179   : > { %3428 = vmatmul.mubr.msk.f32.vlgmr.msra.gmra.mrb[26].mxu1 %vm1108_vm2, %v2991_v19 }
 0x17a   : > { %3430 = vmatprep.mubr.msk.f32.mxu1 %vm1108_vm2, %v2992_v25  ;;  %v4685_v48 = vpop.f32.mrb[22].mxu0 }
 0x17b   : > { %v4687_v59 = vpop.f32.mrb[23].mxu0 }
 0x17d   : > { %3431 = vmatmul.mubr.msk.f32.gmra.mrb[28].mxu1 %vm1108_vm2, %v2993_v27 }
 0x17e   : > { %3433 = vmatprep.mubr.msk.f32.mxu1 %vm1108_vm2, %v2994_v28  ;;  %v4689_v61 = vpop.f32.mrb[24].mxu0 }
 0x17f   : > { %v4691_v63 = vpop.f32.mrb[25].mxu0 }
 0x181   : > { %3434 = vmatmul.mubr.msk.f32.gmra.mrb[30].mxu1 %vm1108_vm2, %v2995_v43  ;;  %v2182_v43 = vstv %s3043_s16  ;;  %s3112_s16 = sshll.u32 %s3943_s30, 8  ;;  %s3957_s30 = smov [#allocation5]  }
 0x182   : > { %3436 = vmatprep.mubr.msk.f32.mxu1 %vm1108_vm2, %v2996_v30  ;;  %v4693_v2 = vpop.f32.mrb[26].mxu0  ;;  %v3853_v30 = vld [vmem:[%s4093_s20] sm:$0x7]  ;;  %s4725_s20 = scalar_lea.vmem [#allocation5], %s2875_s26  ;;  %s3873_s26 = sshll.u32 %s3957_s30, 4  ;;  %s3874_s26 = int_to_ptr.vmem [resolvable:$false] %s3873_s26 }
 0x183   : > { %v4695_v1 = vpop.f32.mrb[27].mxu0  ;;  %s3875_s12 = scalar_lea.vmem %s3874_s26, 512 }
 0x185   : > { %3437 = vmatmul.mubr.msk.f32.gmra.mrb[32].mxu1 %vm1108_vm2, %v2997_v33  ;;  %v2183_v33 = vmul.f32 %v3853_v30, %v2182_v43  ;;  %v2199_v43 = vstv %s3046_s22  ;;  %s4889_s22 = scalar_lea.hbm %s4949_s8, %s3112_s16 }
 0x186   : > { %3439 = vmatprep.mubr.msk.f32.mxu1 %vm1108_vm2, %v2998_v34  ;;  %v4697_v4 = vpop.f32.mrb[28].mxu0  ;;  %v2179_v34 = vstv %s3042_s19  ;;  %v2200_v51 = vmul.f32 %v3853_v30, %v2199_v43 }
 0x187   : > { %v4699_v6 = vpop.f32.mrb[29].mxu0 }
 0x189   : > { %3440 = vmatmul.mubr.msk.f32.gmra.mrb[34].mxu1 %vm1108_vm2, %v2999_v35  ;;  %v2189_v35 = vstv %s3044_s21 }
 0x18a   : > { %3442 = vmatprep.mubr.msk.f32.mxu1 %vm1108_vm2, %v3000_v36  ;;  %v4701_v7 = vpop.f32.mrb[30].mxu0  ;;  %v2180_v36 = vmul.f32 %v3853_v30, %v2179_v34 }
 0x18b   : > { %v4703_v11 = vpop.f32.mrb[31].mxu0 }
 0x18d   : > { %3443 = vmatmul.mubr.msk.f32.gmra.mrb[36].mxu1 %vm1108_vm2, %v3001_v52  ;;  %v2185_v52 = vrot.slane %v2183_v33, 1 }
 0x18e   : > { %3445 = vmatprep.mubr.msk.f32.mxu1 %vm1108_vm2, %v3002_v37  ;;  %v4705_v15 = vpop.f32.mrb[32].mxu0  ;;  %v2190_v37 = vmul.f32 %v3853_v30, %v2189_v35  ;;  %v2196_v35 = vstv %s3045_s23  ;;  %s4895_s23 = scalar_lea.sflag [#allocation3], %s360_s24 }
 0x18f   : > { %v4707_v32 = vpop.f32.mrb[33].mxu0 }
 0x191   : > { %3446 = vmatmul.mubr.msk.f32.gmra.mrb[38].mxu1 %vm1108_vm2, %v3003_v40  ;;  %v2187_v40 = vadd.f32 %v2185_v52, %v2180_v36  ;;  %v2206_v36 = vstv %s3047_s25  ;;  %v2197_v52 = vmul.f32 %v3853_v30, %v2196_v35  ;;  %v4975_v35 = vmov 0.0|0.0  }
 0x192   : > { %3448 = vmatprep.mubr.msk.f32.mxu1 %vm1108_vm2, %v3004_v38  ;;  %v4709_v17 = vpop.f32.mrb[34].mxu0  ;;  %v2192_v38 = vrot.slane %v2190_v37, 2  ;;  %v2202_v37 = vrot.slane %v2200_v51, 1 }
 0x193   : > { %v4711_v21 = vpop.f32.mrb[35].mxu0 }
 0x194   : > { %v2204_v14 = vadd.f32 %v2202_v37, %v2197_v52 }
 0x195   : > { %3449 = vmatmul.mubr.msk.f32.gmra.mrb[40].mxu1 %vm1108_vm2, %v3005_v44  ;;  %v2194_v44 = vadd.f32 %v2192_v38, %v2187_v40 }
 0x196   : > { %3546 = vmatprep.mubr.msk.f32.mxu1 %vm3956_vm15, %v4950_v49  ;;  %v4713_v19 = vpop.f32.mrb[36].mxu0 }
 0x197   : > { %v4715_v25 = vpop.f32.mrb[37].mxu0  ;;  %v2212_v49 = vadd.f32 1.0, %v2194_v44 }
 0x198   : > { %4972 = vst [vmem:[#allocation14_spill] sm:$0xff] %v4715_v25 }
 0x199   : > { %v2213_v26 = vmul.f32 16.0, %v2212_v49 }
 0x19a   : > { %v4717_v27 = vpop.f32.mrb[38].mxu0 }
 0x19b   : > { %4973 = vst [vmem:[#allocation15_spill] sm:$0xff] %v4717_v27  ;;  %v4719_v28 = vpop.f32.mrb[39].mxu0  ;;  %v3048_v29 = vadd.f32 -1.0, %v2213_v26  ;;  %v2207_v26 = vmul.f32 %v3853_v30, %v2206_v36 }
 0x19c   : > { %4974 = vst [vmem:[#allocation16_spill] sm:$0xff] %v4719_v28 }
 0x19d   : > { %v2215_v23 = vmul.f32 0.5, %v3048_v29  ;;  %v2209_v27 = vrot.slane %v2207_v26, 2 }
 0x19f   : > { %v2220_v34 = vfloor.f32 %v2215_v23 }
 0x1a1   : > { %v3778_v44 = vtrunc.f32 %v2220_v34 }
 0x1a3   : > { %v3779_v10 = vcvt.f32.s32 %v3778_v44 }
 0x228   : > { %v987_v16 = vpop.f32.mrb[8].mxu1 }
 0x229   : > { %2740 = vst [vmem:[%s4725_s20] sm:$0xff] %v987_v16  ;;  %v3366_v33 = vpop.f32.mrb[9].mxu1 }
 0x22c   : > { %v3373_v49 = vpop.f32.mrb[10].mxu1 }
 0x22d   : > { %v1532_v40 = vmul.f32 %v4657_v45, %v3373_v49  ;;  %v1223_v38 = vpop.f32.mrb[11].mxu1  ;;  %v2211_v45 = vadd.f32 %v2209_v27, %v2204_v14 }
 0x22e   : > { %v1531_v29 = vmul.f32 %v4659_v53, %v1223_v38  ;;  %v2489_v53 = vadd.s32 1, %v3779_v10 }
 0x230   : > { %v3709_v28 = vpack.c.bf16 %v1532_v40, %v1531_v29  ;;  %v3376_v43 = vpop.f32.mrb[12].mxu1  ;;  %v2493_v14 = vrot.slane %v2489_v53, %v4130_v22 }
 0x231   : > { %v1534_v16 = vmul.f32 %v4661_v41, %v3376_v43  ;;  %v1233_v33 = vpop.f32.mrb[13].mxu1  ;;  %v2222_v41 = vsub.f32 %v2215_v23, %v2220_v34 }
 0x232   : > { %v1533_v25 = vmul.f32 %v4663_v46, %v1233_v33  ;;  %3710 = vmatpush3.bf16.msra.mxu1 %v3709_v28  ;;  %v2475_v46 = vrot.slane %v3779_v10, %v4130_v22  ;;  %v2216_v28 = vadd.f32 1.0, %v2211_v45  ;;  %vm2494_vm3 = vcmp.eq.s32.totalorder %v4107_v8, %v2493_v14 }
 0x233   : > { %3711 = vmatprep.subr.bf16.mxu1 %v4975_v35  ;;  %vm2495_vm4 = vcmp.eq.s32.totalorder %v4115_v13, %v2493_v14  ;;  %v2503_v43 = vrot.slane %v2222_v41, %v4130_v22 }
 0x234   : > { %v3712_v51 = vpack.c.bf16 %v1534_v16, %v1533_v25  ;;  %v3379_v30 = vpop.f32.mrb[14].mxu1  ;;  %vm2476_vm1 = vcmp.eq.s32.totalorder %v4107_v8, %v2475_v46  ;;  %v2217_v23 = vmul.f32 16.0, %v2216_v28  ;;  %vm2477_vm14 = vcmp.eq.s32.totalorder %v4115_v13, %v2475_v46 }
 0x235   : > { %v1536_v36 = vmul.f32 %v4665_v54, %v3379_v30  ;;  %v1243_v49 = vpop.f32.mrb[15].mxu1 }
 0x236   : > { %v1535_v40 = vmul.f32 %v4667_v47, %v1243_v49  ;;  %3713 = vmatpush3.bf16.msra.mxu1 %v3712_v51  ;;  %v2482_v47 = vsub.f32 1.0, %v2222_v41 }
 0x237   : > { %3714 = vmatprep.subr.bf16.mxu1 %v4975_v35 }
 0x238   : > { %v3715_v52 = vpack.c.bf16 %v1536_v36, %v1535_v40  ;;  %v3382_v37 = vpop.f32.mrb[16].mxu1  ;;  %v2486_v29 = vrot.slane %v2482_v47, %v4130_v22  ;;  %v3049_v36 = vadd.f32 -1.0, %v2217_v23 }
 0x239   : > { %v1538_v26 = vmul.f32 %v4669_v18, %v3382_v37  ;;  %v1253_v25 = vpop.f32.mrb[17].mxu1 }
 0x23a   : > { %v1537_v54 = vmul.f32 %v4671_v12, %v1253_v25  ;;  %3716 = vmatpush3.bf16.msra.mxu1 %v3715_v52  ;;  %v4976_v12 = vmov 0.0   ;;  %v2219_v25 = vmul.f32 0.5, %v3049_v36 }
 0x23b   : > { %3717 = vmatprep.subr.bf16.mxu1 %v4975_v35  ;;  %v3086_v44 = vsel %vm2476_vm1, 1.0, %v4976_v12  ;;  %v3087_v33 = vsel %vm2477_vm14, 1.0, %v4976_v12  ;;  %v3088_v51 = vsel %vm2494_vm3, 1.0, %v4976_v12  ;;  %v3089_v30 = vsel %vm2495_vm4, 1.0, %v4976_v12 }
 0x23c   : > { %v3718_v27 = vpack.c.bf16 %v1538_v26, %v1537_v54  ;;  %v3385_v38 = vpop.f32.mrb[18].mxu1  ;;  %v2487_v53 = vmul.f32 %v3086_v44, %v2486_v29  ;;  %v2488_v40 = vmul.f32 %v3087_v33, %v2486_v29  ;;  %v2504_v41 = vmul.f32 %v3088_v51, %v2503_v43 }
 0x23d   : > { %v1540_v34 = vmul.f32 %v4673_v42, %v3385_v38  ;;  %v1263_v10 = vpop.f32.mrb[19].mxu1  ;;  %v2505_v52 = vmul.f32 %v3089_v30, %v2503_v43  ;;  %v2221_v23 = vfloor.f32 %v2219_v25 }
 0x23e   : > { %v1539_v18 = vmul.f32 %v4675_v50, %v1263_v10  ;;  %3719 = vmatpush3.bf16.msra.mxu1 %v3718_v27 }
 0x23f   : > { %3720 = vmatprep.subr.bf16.mxu1 %v4975_v35  ;;  %v3780_v29 = vtrunc.f32 %v2221_v23 }
 0x240   : > { %v3721_v16 = vpack.c.bf16 %v1540_v34, %v1539_v18  ;;  %v3388_v42 = vpop.f32.mrb[20].mxu1 }
 0x241   : > { %v1542_v45 = vmul.f32 %v4677_v56, %v3388_v42  ;;  %v1273_v50 = vpop.f32.mrb[21].mxu1  ;;  %v2506_v56 = vadd.f32 %v2504_v41, %v2487_v53  ;;  %v3781_v51 = vcvt.f32.s32 %v3780_v29 }
 0x242   : > { %v1541_v49 = vmul.f32 %v4679_v55, %v1273_v50  ;;  %3722 = vmatpush3.bf16.msra.mxu1 %v3721_v16  ;;  %v2507_v55 = vadd.f32 %v2505_v52, %v2488_v40 }
 0x243   : > { %3723 = vmatprep.subr.bf16.mxu1 %v4975_v35  ;;  %v2243_v50 = vadd.s32 1, %v3781_v51  ;;  %v2229_v53 = vrot.slane %v3781_v51, %v4130_v22  ;;  %v3055_v51 = vld [vmem:[%s4584_s11 + $0x108] sm:$0xff] }
 0x244   : > { %v3724_v37 = vpack.c.bf16 %v1542_v45, %v1541_v49  ;;  %v3391_v46 = vpop.f32.mrb[22].mxu1 }
 0x245   : > { %v1544_v28 = vmul.f32 %v4681_v58, %v3391_v46  ;;  %v1283_v26 = vpop.f32.mrb[23].mxu1  ;;  %v3736_v58 = vpack.c.bf16 %v2507_v55, %v2506_v56  ;;  %v2247_v41 = vrot.slane %v2243_v50, %v4130_v22  ;;  %vm2230_vm5 = vcmp.eq.s32.totalorder %v4107_v8, %v2229_v53  ;;  %v3062_v50 = vld [vmem:[%s4584_s11 + $0x140] sm:$0xff] }
 0x246   : > { %v1543_v14 = vmul.f32 %v4683_v9, %v1283_v26  ;;  %3725 = vmatpush3.bf16.msra.mxu1 %v3724_v37  ;;  %vm2231_vm6 = vcmp.eq.s32.totalorder %v4115_v13, %v2229_v53  ;;  %v3067_v53 = vld [vmem:[%s4584_s11 + $0x168] sm:$0xff] }
 0x247   : > { %3726 = vmatprep.subr.bf16.mxu1 %v4975_v35  ;;  %vm2248_vm7 = vcmp.eq.s32.totalorder %v4107_v8, %v2247_v41  ;;  %vm2249_vm8 = vcmp.eq.s32.totalorder %v4115_v13, %v2247_v41  ;;  %v3051_v13 = vsel %vm2231_vm6, 1.0, %v4976_v12 }
 0x248   : > { %v3727_v54 = vpack.c.bf16 %v1544_v28, %v1543_v14  ;;  %v3394_v47 = vpop.f32.mrb[24].mxu1 }
 0x249   : > { %v1546_v27 = vmul.f32 %v4685_v48, %v3394_v47  ;;  %v1293_v38 = vpop.f32.mrb[25].mxu1  ;;  %v4768_v48 = vld [vmem:[%s4942_s1] sm:$0xff] }
 0x24a   : > { %v1545_v34 = vmul.f32 %v4687_v59, %v1293_v38  ;;  %3728 = vmatpush3.bf16.msra.mxu1 %v3727_v54 }
 0x24b   : > { %3729 = vmatprep.subr.bf16.mxu1 %v4975_v35 }
 0x24c   : > { %v3730_v10 = vpack.c.bf16 %v1546_v27, %v1545_v34  ;;  %v3429_v18 = vpop.f32.mrb[26].mxu1  ;;  %v4978_v27 = vld [vmem:[#allocation8_spill] sm:$0xff] }
 0x24d   : > { %v2023_v9 = vmul.f32 %v4689_v61, %v3429_v18  ;;  %v1762_v44 = vpop.f32.mrb[27].mxu1  ;;  %v4980_v18 = vld [vmem:[#allocation9_spill] sm:$0xff] }
 0x24e   : > { %v2022_v43 = vmul.f32 %v4691_v63, %v1762_v44  ;;  %3731 = vmatpush3.bf16.msra.mxu1 %v3730_v10  ;;  %v4982_v44 = vld [vmem:[#allocation10_spill] sm:$0xff] }
 0x24f   : > { %3737 = vmatprep.subr.bf16.mxu1 %v3736_v58 }
 0x250   : > { %v3685_v59 = vpack.c.bf16 %v2023_v9, %v2022_v43  ;;  %v3432_v16 = vpop.f32.mrb[28].mxu1 }
 0x251   : > { %v2025_v42 = vmul.f32 %v4693_v2, %v3432_v16  ;;  %v1772_v33 = vpop.f32.mrb[29].mxu1  ;;  %3547 = vmatmul.mubr.f32.vlgmr.msra.gmra.mrb[42].mxu1 %v4768_v48  ;;  %v4984_v16 = vld [vmem:[#allocation12_spill] sm:$0xff] }
 0x252   : > { %v2024_v61 = vmul.f32 %v4695_v1, %v1772_v33  ;;  %3686 = vmatpush3.bf16.msra.mxu0 %v3685_v59  ;;  %3739 = vmatpush3.bf16.msra.mxu1 %v3736_v58  ;;  %v4979_v58 = vld [vmem:[#allocation15_spill] sm:$0xff]  ;;  %v4985_v33 = vld [vmem:[#allocation13_spill] sm:$0xff] }
 0x253   : > { %3687 = vmatprep.subr.bf16.mxu0 %v4975_v35  ;;  %3581 = vmatprep.mubr.msk.f32.mxu1 %vm1108_vm2, %v4388_v24  ;;  %v2223_v24 = vsub.f32 %v2219_v25, %v2221_v23  ;;  %v4983_v59 = vld [vmem:[#allocation11_spill] sm:$0xff] }
 0x254   : > { %v3688_v63 = vpack.c.bf16 %v2025_v42, %v2024_v61  ;;  %v3435_v30 = vpop.f32.mrb[30].mxu1  ;;  %3740 = vmatprep.subr.bf16.mxu1 %v4975_v35  ;;  %v3054_v42 = vld [vmem:[%s4584_s11 + $0x100] sm:$0xff]  ;;  %v3056_v61 = vld [vmem:[%s4584_s11 + $0x110] sm:$0xff] }
 0x255   : > { %v2027_v45 = vmul.f32 %v4697_v4, %v3435_v30  ;;  %v1782_v2 = vpop.f32.mrb[31].mxu1  ;;  %3582 = vmatmul.mubr.msk.f32.vlgmr.msra.gmra.mrb[44].mxu1 %vm1108_vm2, %v4395_v31  ;;  %v3058_v30 = vld [vmem:[%s4584_s11 + $0x120] sm:$0xff] }
 0x256   : > { %v2026_v1 = vmul.f32 %v4699_v6, %v1782_v2  ;;  %3689 = vmatpush3.bf16.msra.mxu0 %v3688_v63  ;;  %3584 = vmatprep.mubr.msk.f32.mxu1 %vm1108_vm2, %v4405_v57  ;;  %v2236_v57 = vsub.f32 1.0, %v2223_v24  ;;  %v3057_v63 = vld [vmem:[%s4584_s11 + $0x118] sm:$0xff]  ;;  %v3060_v2 = vld [vmem:[%s4584_s11 + $0x130] sm:$0xff] }
 0x257   : > { %3690 = vmatprep.subr.bf16.mxu0 %v4975_v35 }
 0x258   : > { %v3691_v36 = vpack.c.bf16 %v2027_v45, %v2026_v1  ;;  %v3438_v49 = vpop.f32.mrb[32].mxu1  ;;  %v3059_v45 = vld [vmem:[%s4584_s11 + $0x128] sm:$0xff] }
 0x259   : > { %v2029_v4 = vmul.f32 %v4701_v7, %v3438_v49  ;;  %v1792_v40 = vpop.f32.mrb[33].mxu1  ;;  %3585 = vmatmul.mubr.msk.f32.gmra.mrb[46].mxu1 %vm1108_vm2, %v4412_v39  ;;  %v3063_v1 = vld [vmem:[%s4584_s11 + $0x148] sm:$0xff]  ;;  %v3066_v49 = vld [vmem:[%s4584_s11 + $0x160] sm:$0xff] }
 0x25a   : > { %v2028_v31 = vmul.f32 %v4703_v11, %v1792_v40  ;;  %3692 = vmatpush3.bf16.msra.mxu0 %v3691_v36  ;;  %3587 = vmatprep.mubr.msk.f32.mxu1 %vm1108_vm2, %v4417_v20  ;;  %v3050_v20 = vsel %vm2230_vm5, 1.0, %v4976_v12  ;;  %v2240_v11 = vrot.slane %v2236_v57, %v4130_v22  ;;  %v3065_v36 = vld [vmem:[%s4584_s11 + $0x158] sm:$0xff] }
 0x25b   : > { %3693 = vmatprep.subr.bf16.mxu0 %v4975_v35  ;;  %v3069_v40 = vld [vmem:[%s4584_s11 + $0x178] sm:$0xff] }
 0x25c   : > { %v3694_v6 = vpack.c.bf16 %v2029_v4, %v2028_v31  ;;  %v3441_v52 = vpop.f32.mrb[34].mxu1  ;;  %v2242_v25 = vmul.f32 %v3051_v13, %v2240_v11  ;;  %v3068_v4 = vld [vmem:[%s4584_s11 + $0x170] sm:$0xff] }
 0x25d   : > { %v2031_v7 = vmul.f32 %v4705_v15, %v3441_v52  ;;  %v1802_v37 = vpop.f32.mrb[35].mxu1  ;;  %3588 = vmatmul.mubr.msk.f32.gmra.mrb[48].mxu1 %vm1108_vm2, %v4426_v60  ;;  %v2257_v15 = vrot.slane %v2223_v24, %v4130_v22  ;;  %v3052_v60 = vsel %vm2248_vm7, 1.0, %v4976_v12  ;;  %v2241_v22 = vmul.f32 %v3050_v20, %v2240_v11  ;;  %v3064_v24 = vld [vmem:[%s4584_s11 + $0x150] sm:$0xff] }
 0x25e   : > { %v2030_v39 = vmul.f32 %v4707_v32, %v1802_v37  ;;  %3695 = vmatpush3.bf16.msra.mxu0 %v3694_v6  ;;  %3590 = vmatprep.mubr.msk.f32.mxu1 %vm1108_vm2, %v4431_v62  ;;  %v3053_v32 = vsel %vm2249_vm8, 1.0, %v4976_v12 }
 0x25f   : > { %3696 = vmatprep.subr.bf16.mxu0 %v4975_v35  ;;  %v2258_v14 = vmul.f32 %v3052_v60, %v2257_v15  ;;  %v2259_v56 = vmul.f32 %v3053_v32, %v2257_v15 }
 0x260   : > { %v3697_v8 = vpack.c.bf16 %v2031_v7, %v2030_v39  ;;  %v3444_v46 = vpop.f32.mrb[36].mxu1 }
 0x261   : > { %v2033_v28 = vmul.f32 %v4709_v17, %v3444_v46  ;;  %v1812_v26 = vpop.f32.mrb[37].mxu1  ;;  %3591 = vmatmul.mubr.msk.f32.gmra.mrb[50].mxu1 %vm1108_vm2, %v4440_v0  ;;  %v4977_v0 = vld [vmem:[#allocation14_spill] sm:$0xff]  ;;  %v2261_v38 = vadd.f32 %v2259_v56, %v2242_v25 }
 0x262   : > { %v2032_v62 = vmul.f32 %v4711_v21, %v1812_v26  ;;  %3698 = vmatpush3.bf16.msra.mxu0 %v3697_v8  ;;  %3593 = vmatprep.mubr.msk.f32.mxu1 %vm1108_vm2, %v4445_v3  ;;  %v2260_v3 = vadd.f32 %v2258_v14, %v2241_v22 }
 0x263   : > { %3699 = vmatprep.subr.bf16.mxu0 %v4975_v35 }
 0x264   : > { %v3700_v55 = vpack.c.bf16 %v2033_v28, %v2032_v62  ;;  %v3447_v54 = vpop.f32.mrb[38].mxu1  ;;  %v3732_v29 = vpack.c.bf16 %v2261_v38, %v2260_v3 }
 0x265   : > { %v2035_v17 = vmul.f32 %v4713_v19, %v3447_v54  ;;  %v1822_v47 = vpop.f32.mrb[39].mxu1  ;;  %3594 = vmatmul.mubr.msk.f32.gmra.mrb[52].mxu1 %vm1108_vm2, %v4454_v5  ;;  %v4981_v5 = vld [vmem:[#allocation16_spill] sm:$0xff] }
 0x266   : > { %v2034_v21 = vmul.f32 %v4977_v0, %v1822_v47  ;;  %3701 = vmatpush3.bf16.msra.mxu0 %v3700_v55  ;;  %3596 = vmatprep.mubr.msk.f32.mxu1 %vm1108_vm2, %v4978_v27 }
 0x267   : > { %3702 = vmatprep.subr.bf16.mxu0 %v4975_v35 }
 0x268   : > { %v3703_v23 = vpack.c.bf16 %v2035_v17, %v2034_v21  ;;  %v3450_v34 = vpop.f32.mrb[40].mxu1 }
 0x269   : > { %v2037_v10 = vmul.f32 %v4979_v58, %v3450_v34  ;;  %v1832_v19 = vpop.f32.mrb[41].mxu1  ;;  %3597 = vmatmul.mubr.msk.f32.gmra.mrb[54].mxu1 %vm1108_vm2, %v4980_v18 }
 0x26a   : > { %v2036_v9 = vmul.f32 %v4981_v5, %v1832_v19  ;;  %3704 = vmatpush3.bf16.msra.mxu0 %v3703_v23  ;;  %3599 = vmatprep.mubr.msk.f32.mxu1 %vm1108_vm2, %v4982_v44 }
 0x26b   : > { %3705 = vmatprep.subr.bf16.mxu0 %v4975_v35 }
 0x26c   : > { %v3706_v43 = vpack.c.bf16 %v2037_v10, %v2036_v9 }
 0x26d   : > { %3600 = vmatmul.mubr.msk.f32.gmra.mrb[56].mxu1 %vm1108_vm2, %v4983_v59 }
 0x26e   : > { %3707 = vmatpush3.bf16.msra.mxu0 %v3706_v43  ;;  %3602 = vmatprep.mubr.msk.f32.mxu1 %vm1108_vm2, %v4984_v16 }
 0x26f   : > { %3733 = vmatprep.subr.bf16.mxu0 %v3732_v29 }
 0x271   : > { %3512 = vmatmul.mubr.f32.vlgmr.msra.gmra.mrb[40].mxu0 %v4768_v48  ;;  %3603 = vmatmul.mubr.msk.f32.gmra.mrb[58].mxu1 %vm1108_vm2, %v4985_v33 }
 0x272   : > { %3735 = vmatpush3.bf16.msra.mxu0 %v3732_v29  ;;  %3553 = vmatprep.mubr.msk.f32.mxu0 %vm1108_vm2, %v3054_v42 }
 0x273   : > { %3637 = vmatprep.mubr.msk.f32.mxu1 %vm3956_vm15, %v4976_v12  ;;  %v3061_v12 = vld [vmem:[%s4584_s11 + $0x138] sm:$0xff]  ;;  %s2757_s11 = sshll.u32 %s4725_s20, 4  ;;  %s4884_s11 = int_to_ptr.vmem [resolvable:$true] %s2757_s11 }
 0x274   : > { %s3869_s25 = scalar_lea.vmem %s4884_s11, 256  ;;  %p3876_p0 = scmp.lt.s32.totalorder %s4884_s11, %s3874_s26 }
 0x275   : > { %3554 = vmatmul.mubr.msk.f32.vlgmr.msra.gmra.mrb[42].mxu0 %vm1108_vm2, %v3055_v51  ;;  %p3870_p10 = scmp.ne.s32.totalorder %s4884_s11, %s3869_s25  ;;  %p3877_p1 = scmp.lt.s32.totalorder %s3875_s12, %s3869_s25 }
 0x276   : > { %3556 = vmatprep.mubr.msk.f32.mxu0 %vm1108_vm2, %v3056_v61 }
 0x277   : > { %p3871_p11 = pnand %p3870_p10, %p4045_p4  ;;  %p3878_p2 = por %p3877_p1, %p3876_p0 }
 0x279   : > { %3557 = vmatmul.mubr.msk.f32.gmra.mrb[44].mxu0 %vm1108_vm2, %v3057_v63  ;;  %p3872_p13 = pneg %p3871_p11 }
 0x27a   : > { %3559 = vmatprep.mubr.msk.f32.mxu0 %vm1108_vm2, %v3058_v30 }
 0x27b   : > { %p3879_p3 = pnand %p3878_p2, %p3872_p13 }
 0x27d   : > { %3560 = vmatmul.mubr.msk.f32.gmra.mrb[46].mxu0 %vm1108_vm2, %v3059_v45 }
 0x27e   : > { %3562 = vmatprep.mubr.msk.f32.mxu0 %vm1108_vm2, %v3060_v2 }
 0x281   : > { %3563 = vmatmul.mubr.msk.f32.gmra.mrb[48].mxu0 %vm1108_vm2, %v3061_v12 }
 0x282   : > { %3565 = vmatprep.mubr.msk.f32.mxu0 %vm1108_vm2, %v3062_v50 }
 0x285   : > { %3566 = vmatmul.mubr.msk.f32.gmra.mrb[50].mxu0 %vm1108_vm2, %v3063_v1 }
 0x286   : > { %3568 = vmatprep.mubr.msk.f32.mxu0 %vm1108_vm2, %v3064_v24 }
 0x289   : > { %3569 = vmatmul.mubr.msk.f32.gmra.mrb[52].mxu0 %vm1108_vm2, %v3065_v36 }
 0x28a   : > { %3571 = vmatprep.mubr.msk.f32.mxu0 %vm1108_vm2, %v3066_v49 }
 0x28d   : > { %3572 = vmatmul.mubr.msk.f32.gmra.mrb[54].mxu0 %vm1108_vm2, %v3067_v53 }
 0x28e   : > { %3574 = vmatprep.mubr.msk.f32.mxu0 %vm1108_vm2, %v3068_v4 }
 0x291   : > { %3575 = vmatmul.mubr.msk.f32.gmra.mrb[56].mxu0 %vm1108_vm2, %v3069_v40 }
 0x328   : > { %v3583_v41 = vpop.f32.mrb[44].mxu1 }
 0x329   : > { %v2574_v31 = vpop.f32.mrb[45].mxu1 }
 0x32c   : > { %v3586_v57 = vpop.f32.mrb[46].mxu1 }
 0x32d   : > { %v2584_v6 = vpop.f32.mrb[47].mxu1 }
 0x330   : > { %v3589_v52 = vpop.f32.mrb[48].mxu1 }
 0x331   : > { %v2594_v7 = vpop.f32.mrb[49].mxu1 }
 0x334   : > { %v3592_v37 = vpop.f32.mrb[50].mxu1 }
 0x335   : > { %v2604_v39 = vpop.f32.mrb[51].mxu1 }
 0x338   : > { %v3595_v20 = vpop.f32.mrb[52].mxu1 }
 0x339   : > { %v2614_v11 = vpop.f32.mrb[53].mxu1 }
 0x33c   : > { %v3598_v15 = vpop.f32.mrb[54].mxu1 }
 0x33d   : > { %v2624_v8 = vpop.f32.mrb[55].mxu1 }
 0x340   : > { %v3601_v46 = vpop.f32.mrb[56].mxu1 }
 0x341   : > { %v2634_v13 = vpop.f32.mrb[57].mxu1 }
 0x344   : > { %v4872_v60 = vpop.f32.mrb[40].mxu0  ;;  %v3604_v32 = vpop.f32.mrb[58].mxu1 }
 0x345   : > { %v3513_v28 = vpop.f32.mrb[41].mxu0  ;;  %v2644_v26 = vpop.f32.mrb[59].mxu1 }
 0x348   : > { %v3555_v62 = vpop.f32.mrb[42].mxu0 }
 0x349   : > { %v2654_v22 = vmul.f32 %v3583_v41, %v3555_v62  ;;  %v2393_v25 = vpop.f32.mrb[43].mxu0 }
 0x34a   : > { %v2653_v14 = vmul.f32 %v2574_v31, %v2393_v25 }
 0x34c   : > { %v3741_v56 = vpack.c.bf16 %v2654_v22, %v2653_v14  ;;  %v3558_v55 = vpop.f32.mrb[44].mxu0 }
 0x34d   : > { %v2656_v54 = vmul.f32 %v3586_v57, %v3558_v55  ;;  %v2403_v17 = vpop.f32.mrb[45].mxu0 }
 0x34e   : > { %v2655_v47 = vmul.f32 %v2584_v6, %v2403_v17  ;;  %3742 = vmatpush3.bf16.msra.mxu1 %v3741_v56 }
 0x34f   : > { %3743 = vmatprep.subr.bf16.mxu1 %v4975_v35 }
 0x350   : > { %v3744_v0 = vpack.c.bf16 %v2656_v54, %v2655_v47  ;;  %v3561_v21 = vpop.f32.mrb[46].mxu0 }
 0x351   : > { %v2658_v27 = vmul.f32 %v3589_v52, %v3561_v21  ;;  %v2413_v3 = vpop.f32.mrb[47].mxu0 }
 0x352   : > { %v2657_v38 = vmul.f32 %v2594_v7, %v2413_v3  ;;  %3745 = vmatpush3.bf16.msra.mxu1 %v3744_v0 }
 0x353   : > { %3746 = vmatprep.subr.bf16.mxu1 %v4975_v35 }
 0x354   : > { %v3747_v23 = vpack.c.bf16 %v2658_v27, %v2657_v38  ;;  %v3564_v34 = vpop.f32.mrb[48].mxu0 }
 0x355   : > { %v2660_v58 = vmul.f32 %v3592_v37, %v3564_v34  ;;  %v2423_v10 = vpop.f32.mrb[49].mxu0 }
 0x356   : > { %v2659_v19 = vmul.f32 %v2604_v39, %v2423_v10  ;;  %3748 = vmatpush3.bf16.msra.mxu1 %v3747_v23 }
 0x357   : > { %3749 = vmatprep.subr.bf16.mxu1 %v4975_v35 }
 0x358   : > { %v3750_v18 = vpack.c.bf16 %v2660_v58, %v2659_v19  ;;  %v3567_v5 = vpop.f32.mrb[50].mxu0 }
 0x359   : > { %v2662_v9 = vmul.f32 %v3595_v20, %v3567_v5  ;;  %v2433_v44 = vpop.f32.mrb[51].mxu0 }
 0x35a   : > { %v2661_v29 = vmul.f32 %v2614_v11, %v2433_v44  ;;  %3751 = vmatpush3.bf16.msra.mxu1 %v3750_v18 }
 0x35b   : > { %3752 = vmatprep.subr.bf16.mxu1 %v4975_v35 }
 0x35c   : > { %v3753_v43 = vpack.c.bf16 %v2662_v9, %v2661_v29  ;;  %v3570_v59 = vpop.f32.mrb[52].mxu0 }
 0x35d   : > { %v2664_v16 = vmul.f32 %v3598_v15, %v3570_v59  ;;  %v2443_v42 = vpop.f32.mrb[53].mxu0 }
 0x35e   : > { %v2663_v33 = vmul.f32 %v2624_v8, %v2443_v42  ;;  %3754 = vmatpush3.bf16.msra.mxu1 %v3753_v43 }
 0x35f   : > { %3755 = vmatprep.subr.bf16.mxu1 %v4975_v35 }
 0x360   : > { %v3756_v51 = vpack.c.bf16 %v2664_v16, %v2663_v33  ;;  %v3573_v61 = vpop.f32.mrb[54].mxu0 }
 0x361   : > { %v2666_v63 = vmul.f32 %v3601_v46, %v3573_v61  ;;  %v2453_v30 = vpop.f32.mrb[55].mxu0 }
 0x362   : > { %v2665_v45 = vmul.f32 %v2634_v13, %v2453_v30  ;;  %3757 = vmatpush3.bf16.msra.mxu1 %v3756_v51 }
 0x363   : > { %3758 = vmatprep.subr.bf16.mxu1 %v4975_v35 }
 0x364   : > { %v3759_v2 = vpack.c.bf16 %v2666_v63, %v2665_v45  ;;  %v3576_v12 = vpop.f32.mrb[56].mxu0 }
 0x365   : > { %v2668_v50 = vmul.f32 %v3604_v32, %v3576_v12  ;;  %v2463_v1 = vpop.f32.mrb[57].mxu0 }
 0x366   : > { %v2667_v24 = vmul.f32 %v2644_v26, %v2463_v1  ;;  %3760 = vmatpush3.bf16.msra.mxu1 %v3759_v2 }
 0x367   : > { %3761 = vmatprep.subr.bf16.mxu1 %v4975_v35 }
 0x368   : > { %v3762_v36 = vpack.c.bf16 %v2668_v50, %v2667_v24 }
 0x36a   : > { %3763 = vmatpush3.bf16.msra.mxu1 %v3762_v36 }
 0x36d   : > { %3638 = vmatmul.mubr.f32.vlgmr.msra.gmra.mrb[42].mxu1 %v4768_v48 }
 0x440   : > { %v2735_v49 = vpop.f32.mrb[42].mxu1 }
 0x441   : > { %v3764_v53 = vadd.f32 %v2735_v49, %v4872_v60  ;;  %v3639_v35 = vpop.f32.mrb[43].mxu1 }
 0x443   : > { %2741 = vst [vmem:[%s4725_s20 + $0x8] sm:$0xff] %v3764_v53 }
 0x444   : > { %3882 = shalt.err (!%p3879_p3)
}
 0x445   : > { %s3883_s24 = scalar_lea.hbm %s4889_s22, 256  ;;  %s3887_s16 = scalar_lea.hbm %s4949_s8, 512 }
 0x446   : > { %p3884_p5 = scmp.ne.s32.totalorder %s4889_s22, %s3883_s24  ;;  %p3888_p9 = scmp.lt.u32.totalorder %s4889_s22, %s4949_s8 }
 0x447   : > { %p3889_p12 = scmp.lt.u32.totalorder %s3887_s16, %s3883_s24  ;;  %p3891_p11 = scmp.lt.u32.totalorder %s3883_s24, %s4889_s22 }
 0x448   : > { %p3885_p6 = pnand %p3884_p5, %p4045_p4 }
 0x449   : > { %p3890_p10 = por %p3889_p12, %p3888_p9 }
 0x44a   : > { %p3886_p7 = pneg %p3885_p6 }
 0x44b   : > { %p3892_p13 = por %p3891_p11, %p3890_p10 }
 0x44d   : > { %p3893_p0 = pnand %p3892_p13, %p3886_p7 }
 0x44f   : > { %3896 = shalt.err (!%p3893_p0)
}
 0x450   : > { %s3958_s25 = smov 128   ;;  %s3959_s30 = smov 8  }
 0x451   : > { %3786 = dma.vmem_to_hbm [thread:$0]  (%p4045_p4), %s4884_s11, 256, %s4889_s22, %s4895_s23, %s3958_s25, %s3958_s25, %s3959_s30  }
 0x452 PF: > { %p3798_p1 = scmp.ge.s32.totalorder %s3951_s10, 2  ;;  %s2772_s26 = sand.u32 1, %s3931_s27  }
 0x453   : > { %s2773_s12 = scalar_lea.sflag [#allocation3], %s2772_s26 }
 0x454   : > { %p3793_p2 = pnand %p3798_p1, %p4052_p8 }
 0x456   : > { %3926 = dma.done.wait (!%p3793_p2), %s2773_s12, 256  }
 0x457   : > { %3928 = vsyncadd (!%p3793_p2), %s2773_s12, 4294967040  ;;  %s22_s10 = sadd.s32 1, %s3951_s10   ;;  %s4986_s27 = smov %s3935_s28 }
 0x458   : > { %p19_p3 = scmp.ge.s32.totalorder %s22_s10, 4   ;;  %s4987_s28 = smov %s3939_s29 }
 0x459   : > { %s4988_s29 = smov %s4058_s18  ;;  %s4989_s30 = smov %s3947_s9 }
 0x45a   : > { %s4990_s9 = smov %s4992_s13  ;;  %21 = sbr.rel (!%p19_p3) target bundleno = 5 (0x5), region = 100 }
 0x461   :  { %2778 = vsyncpa [#allocation3], 1 }
 0x462   :  { %2780 = vsyncpa [#allocation3 + $0x1], 1 }
 0x463   :  { %2781 = vsyncpa [#allocation4], 1 }
 0x464   :  { %2783 = vsyncpa [#allocation4 + $0x1], 1 }

</bundles_post_ra>
